<compile_context>
chip_gen: v6e
topology: v6e:2x2x1
jax: 0.10.0
libtpu: 0.0.40
codegen_flags: <defaults>
</compile_context>

<pallas_src>
import functools
import math

import jax
import jax.numpy as jnp
from jax import lax
from jax.experimental import pallas as pl
from jax.experimental.pallas import tpu as pltpu


def rnn_kernel(xc_ref, wp_ref, bp_ref,
               wih_ref, bih_ref, whh_ref, bhh_ref,
               dbi_ref, dwhh_ref, dbhh_ref,
               wod_ref, bod_ref, wol_ref, bol_ref,
               out_ref, h_ref):
    t_chunk, tile_n, D = xc_ref.shape
    H = wp_ref.shape[1]
    P = out_ref.shape[0]
    t_idx = pl.program_id(1)

    @pl.when(t_idx == 0)
    def _():
        h_ref[...] = jnp.zeros_like(h_ref)

    # ---- hoisted input path: two big matmuls over the whole (t_chunk*tile_n)
    #      slab (preprocess Linear+ReLU, then the fused x @ [W_ir|W_iz|W_in]).
    #      Reshape is done in unpacked f32 layout (pure sublane concat of the
    #      leading dims), then dropped back to bf16 for the MXU.
    x2d = (xc_ref[...].astype(jnp.float32)
           .reshape(t_chunk * tile_n, D)
           .astype(jnp.bfloat16))
    pre = jnp.maximum(
        jnp.dot(x2d, wp_ref[...], preferred_element_type=jnp.float32)
        + bp_ref[...], 0.0)
    gi = (jnp.dot(pre.astype(jnp.bfloat16), wih_ref[...],
                  preferred_element_type=jnp.float32)
          + bih_ref[...])                                  # (t_chunk*tile_n, 3H) f32

    whh = whh_ref[...]                                     # (H, 3H) bf16
    bhh_b = jnp.broadcast_to(bhh_ref[...], (tile_n, 3 * H))  # hoisted broadcast

    def gru_cell(gi_t, h, whh_w, bhh_full):
        # Fused h-path matmul; PyTorch gate order [r, z, n] along the 3H axis.
        gh = jnp.dot(h.astype(jnp.bfloat16), whh_w,
                     preferred_element_type=jnp.float32) + bhh_full
        r = jax.nn.sigmoid(gi_t[:, 0:H] + gh[:, 0:H])
        z = jax.nn.sigmoid(gi_t[:, H:2 * H] + gh[:, H:2 * H])
        n = jnp.tanh(gi_t[:, 2 * H:3 * H] + r * gh[:, 2 * H:3 * H])
        return (1.0 - z) * n + z * h

    # ---- encoder recurrence (only h @ W_hh is serial); fully unrolled.
    h = h_ref[...]
    for t in range(t_chunk):
        gi_t = gi[t * tile_n:(t + 1) * tile_n, :]          # static, tile-aligned slice
        h = gru_cell(gi_t, h, whh, bhh_b)
    h_ref[...] = h

    # ---- decoder + output epilogue on the last T-chunk only.
    @pl.when(t_idx == pl.num_programs(1) - 1)
    def _():
        dwhh = dwhh_ref[...]                               # (H, 3H) bf16
        dbhh_b = jnp.broadcast_to(dbhh_ref[...], (tile_n, 3 * H))
        # decoder input is all-zeros, so its input-gate term is exactly b_ih.
        dbi_b = jnp.broadcast_to(dbi_ref[...], (tile_n, 3 * H))
        wod = wod_ref[...]                                 # (H, H) bf16
        bod_b = jnp.broadcast_to(bod_ref[...], (tile_n, H))
        wol = wol_ref[...]                                 # (O, H) bf16
        bol = bol_ref[...]                                 # (O, 1) f32

        hd = h
        for p in range(P):                                 # prediction_length: small, static
            hd = gru_cell(dbi_b, hd, dwhh, dbhh_b)
            y = jnp.maximum(
                jnp.dot(hd.astype(jnp.bfloat16), wod,
                        preferred_element_type=jnp.float32) + bod_b, 0.0)
            # feature-major output: (O, H) x (tile_n, H)^T -> (O, tile_n),
            # lane-dense store along N.
            out_ref[p] = lax.dot_general(
                wol, y.astype(jnp.bfloat16),
                dimension_numbers=(((1,), (1,)), ((), ())),
                preferred_element_type=jnp.float32) + bol


def init_params(key, num_locations, input_feature_dim, hidden_dim):
    D = input_feature_dim + 4
    H = hidden_dim
    ks = jax.random.split(key, 16)

    def u(k, shape, fan_in):
        bound = 1.0 / math.sqrt(fan_in)
        return jax.random.uniform(k, shape, jnp.float32, -bound, bound)

    return dict(
        emb=jax.random.normal(ks[0], (num_locations, 4), jnp.float32),
        wp=u(ks[1], (H, D), D), bp=u(ks[2], (H,), D),
        enc_wih=u(ks[3], (3 * H, H), H), enc_whh=u(ks[4], (3 * H, H), H),
        enc_bih=u(ks[5], (3 * H,), H), enc_bhh=u(ks[6], (3 * H,), H),
        # decoder GRU input weight (3H, 1) exists in the module but its input
        # is always zeros; it contributes exactly 0 and is not passed to the
        # kernel (only the decoder b_ih is).
        dec_wih=u(ks[7], (3 * H, 1), H),
        dec_whh=u(ks[8], (3 * H, H), H),
        dec_bih=u(ks[9], (3 * H,), H), dec_bhh=u(ks[10], (3 * H,), H),
        wod=u(ks[11], (H, H), H), bod=u(ks[12], (H,), H),
        wol=u(ks[13], (2, H), H), bol=u(ks[14], (2,), H),
    )


def _largest_divisor(n, cap, mult):
    best = 0
    d = mult
    while d <= min(n, cap):
        if n % d == 0:
            best = d
        d += mult
    return best


def _pick_tile_n(n):
    # last-dim (lane) constraint on the output block: multiple of 128 or == N.
    d = _largest_divisor(n, 512, 128)
    return d if d > 0 else n


def _pick_t_chunk(t):
    d = _largest_divisor(t, 16, 1)
    return d if d > 0 else t


def _resident_spec(arr):
    # Same block for every grid step -> DMA'd once, stays resident in VMEM.
    nd = arr.ndim
    return pl.BlockSpec(arr.shape, lambda n, t, _nd=nd: (0,) * _nd)


@functools.partial(jax.jit, static_argnames=("prediction_length",))
def forward(params, x, locations, prediction_length=3):
    B, T, L, F = x.shape
    H = params["wp"].shape[0]
    D = F + 4
    N = B * L
    P = prediction_length
    O = 2
    H3 = 3 * H

    # Glue: embedding gather + concat; single transposed copy (same cost as the
    # module's own swapaxes) into the time-major (T, N, D) layout the kernel
    # streams, cast to bf16 to halve HBM/VMEM bytes.
    loc_emb = jnp.take(params["emb"], locations, axis=0)        # (B, T, L, 4)
    xc = jnp.concatenate([x, loc_emb], axis=-1)                 # (B, T, L, D)
    xc_tm = (jnp.transpose(xc, (1, 0, 2, 3))
             .reshape(T, N, D).astype(jnp.bfloat16))            # (T, N, D), n = b*L + l

    tile_n = _pick_tile_n(N)
    t_chunk = _pick_t_chunk(T)
    n_blocks = N // tile_n
    t_blocks = T // t_chunk

    # Fused, pre-transposed weight slabs (gate order [r, z, n] along 3H).
    args = (
        xc_tm,
        params["wp"].T.astype(jnp.bfloat16),        # (D, H)
        params["bp"].reshape(1, H),                 # f32
        params["enc_wih"].T.astype(jnp.bfloat16),   # (H, 3H)
        params["enc_bih"].reshape(1, H3),
        params["enc_whh"].T.astype(jnp.bfloat16),   # (H, 3H)
        params["enc_bhh"].reshape(1, H3),
        params["dec_bih"].reshape(1, H3),
        params["dec_whh"].T.astype(jnp.bfloat16),   # (H, 3H)
        params["dec_bhh"].reshape(1, H3),
        params["wod"].T.astype(jnp.bfloat16),       # (H, H)
        params["bod"].reshape(1, H),
        params["wol"].astype(jnp.bfloat16),         # (O, H), used in NT form
        params["bol"].reshape(O, 1),
    )

    in_specs = [pl.BlockSpec((t_chunk, tile_n, D), lambda n, t: (t, n, 0))]
    in_specs += [_resident_spec(a) for a in args[1:]]

    grid_spec = pltpu.PrefetchScalarGridSpec(
        num_scalar_prefetch=0,
        grid=(n_blocks, t_blocks),                  # N parallel, T serial (last)
        in_specs=in_specs,
        out_specs=pl.BlockSpec((P, O, tile_n), lambda n, t: (0, 0, n)),
        scratch_shapes=[pltpu.VMEM((tile_n, H), jnp.float32)],   # carried hidden state
    )

    out = pl.pallas_call(
        rnn_kernel,
        out_shape=jax.ShapeDtypeStruct((P, O, N), jnp.float32),
        grid_spec=grid_spec,
        compiler_params=pltpu.CompilerParams(
            dimension_semantics=("parallel", "arbitrary"),
            vmem_limit_bytes=32 * 1024 * 1024),     # safe on v5e/v6e/v7x
    )(*args)

    # (P, O, N) -> (P, O, B, L) -> (B, P, L, O)   (matches torch swapaxes(1, 2))
    return jnp.transpose(out.reshape(P, O, B, L), (2, 0, 3, 1))


if __name__ == "__main__":
    B, T, L, F, H, P = 2, 8, 4, 4, 32, 3
    num_locations = 10

    key = jax.random.PRNGKey(0)
    kx, kl, kp = jax.random.split(key, 3)
    x = jax.random.normal(kx, (B, T, L, F), jnp.float32)
    locations = jax.random.randint(kl, (B, T, L), 0, num_locations, dtype=jnp.int32)
    params = init_params(kp, num_locations, F, H)

    out = forward(params, x, locations, prediction_length=P)
    jax.block_until_ready(out)
    assert out.shape == (B, P, L, 2), out.shape
    assert out.dtype == jnp.float32
    print("KERNEL_OK")
</pallas_src>

<mosaic_0001>
module attributes {stable_mosaic.version = 11 : i64} {
  func.func @rnn_kernel(%arg0: i32, %arg1: i32, %arg2: memref<8x8x8xbf16, #tpu.memory_space<vmem>>, %arg3: memref<8x32xbf16, #tpu.memory_space<vmem>>, %arg4: memref<1x32xf32, #tpu.memory_space<vmem>>, %arg5: memref<32x96xbf16, #tpu.memory_space<vmem>>, %arg6: memref<1x96xf32, #tpu.memory_space<vmem>>, %arg7: memref<32x96xbf16, #tpu.memory_space<vmem>>, %arg8: memref<1x96xf32, #tpu.memory_space<vmem>>, %arg9: memref<1x96xf32, #tpu.memory_space<vmem>>, %arg10: memref<32x96xbf16, #tpu.memory_space<vmem>>, %arg11: memref<1x96xf32, #tpu.memory_space<vmem>>, %arg12: memref<32x32xbf16, #tpu.memory_space<vmem>>, %arg13: memref<1x32xf32, #tpu.memory_space<vmem>>, %arg14: memref<2x32xbf16, #tpu.memory_space<vmem>>, %arg15: memref<2x1xf32, #tpu.memory_space<vmem>>, %arg16: memref<3x2x8xf32, #tpu.memory_space<vmem>>, %arg17: memref<8x32xf32, #tpu.memory_space<vmem>>) attributes {dimension_semantics = [#tpu.dimension_semantics<parallel>, #tpu.dimension_semantics<arbitrary>], iteration_bounds = array<i64: 1, 1>, scalar_prefetch = 0 : i64, scratch_operands = 1 : i64, tpu.core_type = #tpu.core_type<tc>, window_params = [{transform_indices = @transform_0, window_bounds = array<i64: 8, 8, 8>}, {pipeline_mode = #tpu.pipeline_mode<synchronous>, transform_indices = @transform_1, window_bounds = array<i64: 8, 32>}, {pipeline_mode = #tpu.pipeline_mode<synchronous>, transform_indices = @transform_2, window_bounds = array<i64: 1, 32>}, {pipeline_mode = #tpu.pipeline_mode<synchronous>, transform_indices = @transform_3, window_bounds = array<i64: 32, 96>}, {pipeline_mode = #tpu.pipeline_mode<synchronous>, transform_indices = @transform_4, window_bounds = array<i64: 1, 96>}, {pipeline_mode = #tpu.pipeline_mode<synchronous>, transform_indices = @transform_5, window_bounds = array<i64: 32, 96>}, {pipeline_mode = #tpu.pipeline_mode<synchronous>, transform_indices = @transform_6, window_bounds = array<i64: 1, 96>}, {pipeline_mode = #tpu.pipeline_mode<synchronous>, transform_indices = @transform_7, window_bounds = array<i64: 1, 96>}, {pipeline_mode = #tpu.pipeline_mode<synchronous>, transform_indices = @transform_8, window_bounds = array<i64: 32, 96>}, {pipeline_mode = #tpu.pipeline_mode<synchronous>, transform_indices = @transform_9, window_bounds = array<i64: 1, 96>}, {pipeline_mode = #tpu.pipeline_mode<synchronous>, transform_indices = @transform_10, window_bounds = array<i64: 32, 32>}, {pipeline_mode = #tpu.pipeline_mode<synchronous>, transform_indices = @transform_11, window_bounds = array<i64: 1, 32>}, {pipeline_mode = #tpu.pipeline_mode<synchronous>, transform_indices = @transform_12, window_bounds = array<i64: 2, 32>}, {pipeline_mode = #tpu.pipeline_mode<synchronous>, transform_indices = @transform_13, window_bounds = array<i64: 2, 1>}, {transform_indices = @transform_14, window_bounds = array<i64: 3, 2, 8>}]} {
    %c0_i32 = arith.constant 0 : i32
    %0 = arith.cmpi eq, %arg1, %c0_i32 : i32
    %1 = arith.extui %0 : i1 to i32
    %c0_i32_0 = arith.constant 0 : i32
    %2 = arith.cmpi ne, %1, %c0_i32_0 : i32
    scf.if %2 {
      %cst_55 = arith.constant 0.000000e+00 : f32
      %269 = vector.broadcast %cst_55 : f32 to vector<8x32xf32>
      %c0_56 = arith.constant 0 : index
      %c0_57 = arith.constant 0 : index
      %270 = vector.load %arg17[%c0_56, %c0_57] : memref<8x32xf32, #tpu.memory_space<vmem>>, vector<8x32xf32>
      tpu.vector_store %arg17[%c0_56, %c0_57], %269 {strides = array<i32>} : memref<8x32xf32, #tpu.memory_space<vmem>>, vector<8x32xf32>,
    } else {
    }
    %c0 = arith.constant 0 : index
    %c0_1 = arith.constant 0 : index
    %c0_2 = arith.constant 0 : index
    %3 = vector.load %arg2[%c0, %c0_1, %c0_2] : memref<8x8x8xbf16, #tpu.memory_space<vmem>>, vector<8x8x8xbf16>
    %4 = arith.extf %3 : vector<8x8x8xbf16> to vector<8x8x8xf32>
    %5 = vector.shape_cast %4 : vector<8x8x8xf32> to vector<64x8xf32>
    %6 = arith.truncf %5 : vector<64x8xf32> to vector<64x8xbf16>
    %c0_3 = arith.constant 0 : index
    %c0_4 = arith.constant 0 : index
    %7 = vector.load %arg3[%c0_3, %c0_4] : memref<8x32xbf16, #tpu.memory_space<vmem>>, vector<8x32xbf16>
    %cst = arith.constant dense<0.000000e+00> : vector<64x32xf32>
    %8 = tpu.matmul %6, %7, %cst {dimension_numbers = #tpu.dot_dimension_numbers<[1], [0], [0], [1], [0, 0, 1, 1], [], []>} : vector<64x8xbf16>, vector<8x32xbf16>, vector<64x32xf32> -> vector<64x32xf32>
    %c0_5 = arith.constant 0 : index
    %c0_6 = arith.constant 0 : index
    %9 = vector.load %arg4[%c0_5, %c0_6] : memref<1x32xf32, #tpu.memory_space<vmem>>, vector<1x32xf32>
    %10 = vector.broadcast %9 : vector<1x32xf32> to vector<64x32xf32>
    %11 = arith.addf %8, %10 : vector<64x32xf32>
    %cst_7 = arith.constant 0.000000e+00 : f32
    %12 = vector.broadcast %cst_7 : f32 to vector<64x32xf32>
    %13 = arith.maximumf %11, %12 : vector<64x32xf32>
    %14 = arith.truncf %13 : vector<64x32xf32> to vector<64x32xbf16>
    %c0_8 = arith.constant 0 : index
    %c0_9 = arith.constant 0 : index
    %15 = vector.load %arg5[%c0_8, %c0_9] : memref<32x96xbf16, #tpu.memory_space<vmem>>, vector<32x96xbf16>
    %cst_10 = arith.constant dense<0.000000e+00> : vector<64x96xf32>
    %16 = tpu.matmul %14, %15, %cst_10 {dimension_numbers = #tpu.dot_dimension_numbers<[1], [0], [0], [1], [0, 0, 1, 1], [], []>} : vector<64x32xbf16>, vector<32x96xbf16>, vector<64x96xf32> -> vector<64x96xf32>
    %c0_11 = arith.constant 0 : index
    %c0_12 = arith.constant 0 : index
    %17 = vector.load %arg6[%c0_11, %c0_12] : memref<1x96xf32, #tpu.memory_space<vmem>>, vector<1x96xf32>
    %18 = vector.broadcast %17 : vector<1x96xf32> to vector<64x96xf32>
    %19 = arith.addf %16, %18 : vector<64x96xf32>
    %c0_13 = arith.constant 0 : index
    %c0_14 = arith.constant 0 : index
    %20 = vector.load %arg7[%c0_13, %c0_14] : memref<32x96xbf16, #tpu.memory_space<vmem>>, vector<32x96xbf16>
    %c0_15 = arith.constant 0 : index
    %c0_16 = arith.constant 0 : index
    %21 = vector.load %arg8[%c0_15, %c0_16] : memref<1x96xf32, #tpu.memory_space<vmem>>, vector<1x96xf32>
    %22 = vector.shape_cast %21 : vector<1x96xf32> to vector<1x96xf32>
    %23 = vector.broadcast %22 : vector<1x96xf32> to vector<8x96xf32>
    %c0_17 = arith.constant 0 : index
    %c0_18 = arith.constant 0 : index
    %24 = vector.load %arg17[%c0_17, %c0_18] : memref<8x32xf32, #tpu.memory_space<vmem>>, vector<8x32xf32>
    %25 = vector.extract_strided_slice %19 {offsets = [0, 0], sizes = [8, 96], strides = [1, 1]} : vector<64x96xf32> to vector<8x96xf32>
    %26 = arith.truncf %24 : vector<8x32xf32> to vector<8x32xbf16>
    %cst_19 = arith.constant dense<0.000000e+00> : vector<8x96xf32>
    %27 = tpu.matmul %26, %20, %cst_19 {dimension_numbers = #tpu.dot_dimension_numbers<[1], [0], [0], [1], [0, 0, 1, 1], [], []>} : vector<8x32xbf16>, vector<32x96xbf16>, vector<8x96xf32> -> vector<8x96xf32>
    %28 = arith.addf %27, %23 : vector<8x96xf32>
    %29 = vector.extract_strided_slice %25 {offsets = [0, 0], sizes = [8, 32], strides = [1, 1]} : vector<8x96xf32> to vector<8x32xf32>
    %30 = vector.extract_strided_slice %28 {offsets = [0, 0], sizes = [8, 32], strides = [1, 1]} : vector<8x96xf32> to vector<8x32xf32>
    %31 = arith.addf %29, %30 : vector<8x32xf32>
    %32 = arith.negf %31 : vector<8x32xf32>
    %33 = math.exp %32 : vector<8x32xf32>
    %cst_20 = arith.constant 1.000000e+00 : f32
    %34 = vector.broadcast %cst_20 : f32 to vector<8x32xf32>
    %35 = arith.addf %34, %33 : vector<8x32xf32>
    %36 = arith.divf %34, %35 : vector<8x32xf32>
    %37 = vector.extract_strided_slice %25 {offsets = [0, 32], sizes = [8, 32], strides = [1, 1]} : vector<8x96xf32> to vector<8x32xf32>
    %38 = vector.extract_strided_slice %28 {offsets = [0, 32], sizes = [8, 32], strides = [1, 1]} : vector<8x96xf32> to vector<8x32xf32>
    %39 = arith.addf %37, %38 : vector<8x32xf32>
    %40 = arith.negf %39 : vector<8x32xf32>
    %41 = math.exp %40 : vector<8x32xf32>
    %cst_21 = arith.constant 1.000000e+00 : f32
    %42 = vector.broadcast %cst_21 : f32 to vector<8x32xf32>
    %43 = arith.addf %42, %41 : vector<8x32xf32>
    %44 = arith.divf %42, %43 : vector<8x32xf32>
    %45 = vector.extract_strided_slice %25 {offsets = [0, 64], sizes = [8, 32], strides = [1, 1]} : vector<8x96xf32> to vector<8x32xf32>
    %46 = vector.extract_strided_slice %28 {offsets = [0, 64], sizes = [8, 32], strides = [1, 1]} : vector<8x96xf32> to vector<8x32xf32>
    %47 = arith.mulf %36, %46 : vector<8x32xf32>
    %48 = arith.addf %45, %47 : vector<8x32xf32>
    %49 = math.tanh %48 : vector<8x32xf32>
    %cst_22 = arith.constant 1.000000e+00 : f32
    %50 = vector.broadcast %cst_22 : f32 to vector<8x32xf32>
    %51 = arith.subf %50, %44 : vector<8x32xf32>
    %52 = arith.mulf %51, %49 : vector<8x32xf32>
    %53 = arith.mulf %44, %24 : vector<8x32xf32>
    %54 = arith.addf %52, %53 : vector<8x32xf32>
    %55 = vector.extract_strided_slice %19 {offsets = [8, 0], sizes = [8, 96], strides = [1, 1]} : vector<64x96xf32> to vector<8x96xf32>
    %56 = arith.truncf %54 : vector<8x32xf32> to vector<8x32xbf16>
    %cst_23 = arith.constant dense<0.000000e+00> : vector<8x96xf32>
    %57 = tpu.matmul %56, %20, %cst_23 {dimension_numbers = #tpu.dot_dimension_numbers<[1], [0], [0], [1], [0, 0, 1, 1], [], []>} : vector<8x32xbf16>, vector<32x96xbf16>, vector<8x96xf32> -> vector<8x96xf32>
    %58 = arith.addf %57, %23 : vector<8x96xf32>
    %59 = vector.extract_strided_slice %55 {offsets = [0, 0], sizes = [8, 32], strides = [1, 1]} : vector<8x96xf32> to vector<8x32xf32>
    %60 = vector.extract_strided_slice %58 {offsets = [0, 0], sizes = [8, 32], strides = [1, 1]} : vector<8x96xf32> to vector<8x32xf32>
    %61 = arith.addf %59, %60 : vector<8x32xf32>
    %62 = arith.negf %61 : vector<8x32xf32>
    %63 = math.exp %62 : vector<8x32xf32>
    %cst_24 = arith.constant 1.000000e+00 : f32
    %64 = vector.broadcast %cst_24 : f32 to vector<8x32xf32>
    %65 = arith.addf %64, %63 : vector<8x32xf32>
    %66 = arith.divf %64, %65 : vector<8x32xf32>
    %67 = vector.extract_strided_slice %55 {offsets = [0, 32], sizes = [8, 32], strides = [1, 1]} : vector<8x96xf32> to vector<8x32xf32>
    %68 = vector.extract_strided_slice %58 {offsets = [0, 32], sizes = [8, 32], strides = [1, 1]} : vector<8x96xf32> to vector<8x32xf32>
    %69 = arith.addf %67, %68 : vector<8x32xf32>
    %70 = arith.negf %69 : vector<8x32xf32>
    %71 = math.exp %70 : vector<8x32xf32>
    %cst_25 = arith.constant 1.000000e+00 : f32
    %72 = vector.broadcast %cst_25 : f32 to vector<8x32xf32>
    %73 = arith.addf %72, %71 : vector<8x32xf32>
    %74 = arith.divf %72, %73 : vector<8x32xf32>
    %75 = vector.extract_strided_slice %55 {offsets = [0, 64], sizes = [8, 32], strides = [1, 1]} : vector<8x96xf32> to vector<8x32xf32>
    %76 = vector.extract_strided_slice %58 {offsets = [0, 64], sizes = [8, 32], strides = [1, 1]} : vector<8x96xf32> to vector<8x32xf32>
    %77 = arith.mulf %66, %76 : vector<8x32xf32>
    %78 = arith.addf %75, %77 : vector<8x32xf32>
    %79 = math.tanh %78 : vector<8x32xf32>
    %cst_26 = arith.constant 1.000000e+00 : f32
    %80 = vector.broadcast %cst_26 : f32 to vector<8x32xf32>
    %81 = arith.subf %80, %74 : vector<8x32xf32>
    %82 = arith.mulf %81, %79 : vector<8x32xf32>
    %83 = arith.mulf %74, %54 : vector<8x32xf32>
    %84 = arith.addf %82, %83 : vector<8x32xf32>
    %85 = vector.extract_strided_slice %19 {offsets = [16, 0], sizes = [8, 96], strides = [1, 1]} : vector<64x96xf32> to vector<8x96xf32>
    %86 = arith.truncf %84 : vector<8x32xf32> to vector<8x32xbf16>
    %cst_27 = arith.constant dense<0.000000e+00> : vector<8x96xf32>
    %87 = tpu.matmul %86, %20, %cst_27 {dimension_numbers = #tpu.dot_dimension_numbers<[1], [0], [0], [1], [0, 0, 1, 1], [], []>} : vector<8x32xbf16>, vector<32x96xbf16>, vector<8x96xf32> -> vector<8x96xf32>
    %88 = arith.addf %87, %23 : vector<8x96xf32>
    %89 = vector.extract_strided_slice %85 {offsets = [0, 0], sizes = [8, 32], strides = [1, 1]} : vector<8x96xf32> to vector<8x32xf32>
    %90 = vector.extract_strided_slice %88 {offsets = [0, 0], sizes = [8, 32], strides = [1, 1]} : vector<8x96xf32> to vector<8x32xf32>
    %91 = arith.addf %89, %90 : vector<8x32xf32>
    %92 = arith.negf %91 : vector<8x32xf32>
    %93 = math.exp %92 : vector<8x32xf32>
    %cst_28 = arith.constant 1.000000e+00 : f32
    %94 = vector.broadcast %cst_28 : f32 to vector<8x32xf32>
    %95 = arith.addf %94, %93 : vector<8x32xf32>
    %96 = arith.divf %94, %95 : vector<8x32xf32>
    %97 = vector.extract_strided_slice %85 {offsets = [0, 32], sizes = [8, 32], strides = [1, 1]} : vector<8x96xf32> to vector<8x32xf32>
    %98 = vector.extract_strided_slice %88 {offsets = [0, 32], sizes = [8, 32], strides = [1, 1]} : vector<8x96xf32> to vector<8x32xf32>
    %99 = arith.addf %97, %98 : vector<8x32xf32>
    %100 = arith.negf %99 : vector<8x32xf32>
    %101 = math.exp %100 : vector<8x32xf32>
    %cst_29 = arith.constant 1.000000e+00 : f32
    %102 = vector.broadcast %cst_29 : f32 to vector<8x32xf32>
    %103 = arith.addf %102, %101 : vector<8x32xf32>
    %104 = arith.divf %102, %103 : vector<8x32xf32>
    %105 = vector.extract_strided_slice %85 {offsets = [0, 64], sizes = [8, 32], strides = [1, 1]} : vector<8x96xf32> to vector<8x32xf32>
    %106 = vector.extract_strided_slice %88 {offsets = [0, 64], sizes = [8, 32], strides = [1, 1]} : vector<8x96xf32> to vector<8x32xf32>
    %107 = arith.mulf %96, %106 : vector<8x32xf32>
    %108 = arith.addf %105, %107 : vector<8x32xf32>
    %109 = math.tanh %108 : vector<8x32xf32>
    %cst_30 = arith.constant 1.000000e+00 : f32
    %110 = vector.broadcast %cst_30 : f32 to vector<8x32xf32>
    %111 = arith.subf %110, %104 : vector<8x32xf32>
    %112 = arith.mulf %111, %109 : vector<8x32xf32>
    %113 = arith.mulf %104, %84 : vector<8x32xf32>
    %114 = arith.addf %112, %113 : vector<8x32xf32>
    %115 = vector.extract_strided_slice %19 {offsets = [24, 0], sizes = [8, 96], strides = [1, 1]} : vector<64x96xf32> to vector<8x96xf32>
    %116 = arith.truncf %114 : vector<8x32xf32> to vector<8x32xbf16>
    %cst_31 = arith.constant dense<0.000000e+00> : vector<8x96xf32>
    %117 = tpu.matmul %116, %20, %cst_31 {dimension_numbers = #tpu.dot_dimension_numbers<[1], [0], [0], [1], [0, 0, 1, 1], [], []>} : vector<8x32xbf16>, vector<32x96xbf16>, vector<8x96xf32> -> vector<8x96xf32>
    %118 = arith.addf %117, %23 : vector<8x96xf32>
    %119 = vector.extract_strided_slice %115 {offsets = [0, 0], sizes = [8, 32], strides = [1, 1]} : vector<8x96xf32> to vector<8x32xf32>
    %120 = vector.extract_strided_slice %118 {offsets = [0, 0], sizes = [8, 32], strides = [1, 1]} : vector<8x96xf32> to vector<8x32xf32>
    %121 = arith.addf %119, %120 : vector<8x32xf32>
    %122 = arith.negf %121 : vector<8x32xf32>
    %123 = math.exp %122 : vector<8x32xf32>
    %cst_32 = arith.constant 1.000000e+00 : f32
    %124 = vector.broadcast %cst_32 : f32 to vector<8x32xf32>
    %125 = arith.addf %124, %123 : vector<8x32xf32>
    %126 = arith.divf %124, %125 : vector<8x32xf32>
    %127 = vector.extract_strided_slice %115 {offsets = [0, 32], sizes = [8, 32], strides = [1, 1]} : vector<8x96xf32> to vector<8x32xf32>
    %128 = vector.extract_strided_slice %118 {offsets = [0, 32], sizes = [8, 32], strides = [1, 1]} : vector<8x96xf32> to vector<8x32xf32>
    %129 = arith.addf %127, %128 : vector<8x32xf32>
    %130 = arith.negf %129 : vector<8x32xf32>
    %131 = math.exp %130 : vector<8x32xf32>
    %cst_33 = arith.constant 1.000000e+00 : f32
    %132 = vector.broadcast %cst_33 : f32 to vector<8x32xf32>
    %133 = arith.addf %132, %131 : vector<8x32xf32>
    %134 = arith.divf %132, %133 : vector<8x32xf32>
    %135 = vector.extract_strided_slice %115 {offsets = [0, 64], sizes = [8, 32], strides = [1, 1]} : vector<8x96xf32> to vector<8x32xf32>
    %136 = vector.extract_strided_slice %118 {offsets = [0, 64], sizes = [8, 32], strides = [1, 1]} : vector<8x96xf32> to vector<8x32xf32>
    %137 = arith.mulf %126, %136 : vector<8x32xf32>
    %138 = arith.addf %135, %137 : vector<8x32xf32>
    %139 = math.tanh %138 : vector<8x32xf32>
    %cst_34 = arith.constant 1.000000e+00 : f32
    %140 = vector.broadcast %cst_34 : f32 to vector<8x32xf32>
    %141 = arith.subf %140, %134 : vector<8x32xf32>
    %142 = arith.mulf %141, %139 : vector<8x32xf32>
    %143 = arith.mulf %134, %114 : vector<8x32xf32>
    %144 = arith.addf %142, %143 : vector<8x32xf32>
    %145 = vector.extract_strided_slice %19 {offsets = [32, 0], sizes = [8, 96], strides = [1, 1]} : vector<64x96xf32> to vector<8x96xf32>
    %146 = arith.truncf %144 : vector<8x32xf32> to vector<8x32xbf16>
    %cst_35 = arith.constant dense<0.000000e+00> : vector<8x96xf32>
    %147 = tpu.matmul %146, %20, %cst_35 {dimension_numbers = #tpu.dot_dimension_numbers<[1], [0], [0], [1], [0, 0, 1, 1], [], []>} : vector<8x32xbf16>, vector<32x96xbf16>, vector<8x96xf32> -> vector<8x96xf32>
    %148 = arith.addf %147, %23 : vector<8x96xf32>
    %149 = vector.extract_strided_slice %145 {offsets = [0, 0], sizes = [8, 32], strides = [1, 1]} : vector<8x96xf32> to vector<8x32xf32>
    %150 = vector.extract_strided_slice %148 {offsets = [0, 0], sizes = [8, 32], strides = [1, 1]} : vector<8x96xf32> to vector<8x32xf32>
    %151 = arith.addf %149, %150 : vector<8x32xf32>
    %152 = arith.negf %151 : vector<8x32xf32>
    %153 = math.exp %152 : vector<8x32xf32>
    %cst_36 = arith.constant 1.000000e+00 : f32
    %154 = vector.broadcast %cst_36 : f32 to vector<8x32xf32>
    %155 = arith.addf %154, %153 : vector<8x32xf32>
    %156 = arith.divf %154, %155 : vector<8x32xf32>
    %157 = vector.extract_strided_slice %145 {offsets = [0, 32], sizes = [8, 32], strides = [1, 1]} : vector<8x96xf32> to vector<8x32xf32>
    %158 = vector.extract_strided_slice %148 {offsets = [0, 32], sizes = [8, 32], strides = [1, 1]} : vector<8x96xf32> to vector<8x32xf32>
    %159 = arith.addf %157, %158 : vector<8x32xf32>
    %160 = arith.negf %159 : vector<8x32xf32>
    %161 = math.exp %160 : vector<8x32xf32>
    %cst_37 = arith.constant 1.000000e+00 : f32
    %162 = vector.broadcast %cst_37 : f32 to vector<8x32xf32>
    %163 = arith.addf %162, %161 : vector<8x32xf32>
    %164 = arith.divf %162, %163 : vector<8x32xf32>
    %165 = vector.extract_strided_slice %145 {offsets = [0, 64], sizes = [8, 32], strides = [1, 1]} : vector<8x96xf32> to vector<8x32xf32>
    %166 = vector.extract_strided_slice %148 {offsets = [0, 64], sizes = [8, 32], strides = [1, 1]} : vector<8x96xf32> to vector<8x32xf32>
    %167 = arith.mulf %156, %166 : vector<8x32xf32>
    %168 = arith.addf %165, %167 : vector<8x32xf32>
    %169 = math.tanh %168 : vector<8x32xf32>
    %cst_38 = arith.constant 1.000000e+00 : f32
    %170 = vector.broadcast %cst_38 : f32 to vector<8x32xf32>
    %171 = arith.subf %170, %164 : vector<8x32xf32>
    %172 = arith.mulf %171, %169 : vector<8x32xf32>
    %173 = arith.mulf %164, %144 : vector<8x32xf32>
    %174 = arith.addf %172, %173 : vector<8x32xf32>
    %175 = vector.extract_strided_slice %19 {offsets = [40, 0], sizes = [8, 96], strides = [1, 1]} : vector<64x96xf32> to vector<8x96xf32>
    %176 = arith.truncf %174 : vector<8x32xf32> to vector<8x32xbf16>
    %cst_39 = arith.constant dense<0.000000e+00> : vector<8x96xf32>
    %177 = tpu.matmul %176, %20, %cst_39 {dimension_numbers = #tpu.dot_dimension_numbers<[1], [0], [0], [1], [0, 0, 1, 1], [], []>} : vector<8x32xbf16>, vector<32x96xbf16>, vector<8x96xf32> -> vector<8x96xf32>
    %178 = arith.addf %177, %23 : vector<8x96xf32>
    %179 = vector.extract_strided_slice %175 {offsets = [0, 0], sizes = [8, 32], strides = [1, 1]} : vector<8x96xf32> to vector<8x32xf32>
    %180 = vector.extract_strided_slice %178 {offsets = [0, 0], sizes = [8, 32], strides = [1, 1]} : vector<8x96xf32> to vector<8x32xf32>
    %181 = arith.addf %179, %180 : vector<8x32xf32>
    %182 = arith.negf %181 : vector<8x32xf32>
    %183 = math.exp %182 : vector<8x32xf32>
    %cst_40 = arith.constant 1.000000e+00 : f32
    %184 = vector.broadcast %cst_40 : f32 to vector<8x32xf32>
    %185 = arith.addf %184, %183 : vector<8x32xf32>
    %186 = arith.divf %184, %185 : vector<8x32xf32>
    %187 = vector.extract_strided_slice %175 {offsets = [0, 32], sizes = [8, 32], strides = [1, 1]} : vector<8x96xf32> to vector<8x32xf32>
    %188 = vector.extract_strided_slice %178 {offsets = [0, 32], sizes = [8, 32], strides = [1, 1]} : vector<8x96xf32> to vector<8x32xf32>
    %189 = arith.addf %187, %188 : vector<8x32xf32>
    %190 = arith.negf %189 : vector<8x32xf32>
    %191 = math.exp %190 : vector<8x32xf32>
    %cst_41 = arith.constant 1.000000e+00 : f32
    %192 = vector.broadcast %cst_41 : f32 to vector<8x32xf32>
    %193 = arith.addf %192, %191 : vector<8x32xf32>
    %194 = arith.divf %192, %193 : vector<8x32xf32>
    %195 = vector.extract_strided_slice %175 {offsets = [0, 64], sizes = [8, 32], strides = [1, 1]} : vector<8x96xf32> to vector<8x32xf32>
    %196 = vector.extract_strided_slice %178 {offsets = [0, 64], sizes = [8, 32], strides = [1, 1]} : vector<8x96xf32> to vector<8x32xf32>
    %197 = arith.mulf %186, %196 : vector<8x32xf32>
    %198 = arith.addf %195, %197 : vector<8x32xf32>
    %199 = math.tanh %198 : vector<8x32xf32>
    %cst_42 = arith.constant 1.000000e+00 : f32
    %200 = vector.broadcast %cst_42 : f32 to vector<8x32xf32>
    %201 = arith.subf %200, %194 : vector<8x32xf32>
    %202 = arith.mulf %201, %199 : vector<8x32xf32>
    %203 = arith.mulf %194, %174 : vector<8x32xf32>
    %204 = arith.addf %202, %203 : vector<8x32xf32>
    %205 = vector.extract_strided_slice %19 {offsets = [48, 0], sizes = [8, 96], strides = [1, 1]} : vector<64x96xf32> to vector<8x96xf32>
    %206 = arith.truncf %204 : vector<8x32xf32> to vector<8x32xbf16>
    %cst_43 = arith.constant dense<0.000000e+00> : vector<8x96xf32>
    %207 = tpu.matmul %206, %20, %cst_43 {dimension_numbers = #tpu.dot_dimension_numbers<[1], [0], [0], [1], [0, 0, 1, 1], [], []>} : vector<8x32xbf16>, vector<32x96xbf16>, vector<8x96xf32> -> vector<8x96xf32>
    %208 = arith.addf %207, %23 : vector<8x96xf32>
    %209 = vector.extract_strided_slice %205 {offsets = [0, 0], sizes = [8, 32], strides = [1, 1]} : vector<8x96xf32> to vector<8x32xf32>
    %210 = vector.extract_strided_slice %208 {offsets = [0, 0], sizes = [8, 32], strides = [1, 1]} : vector<8x96xf32> to vector<8x32xf32>
    %211 = arith.addf %209, %210 : vector<8x32xf32>
    %212 = arith.negf %211 : vector<8x32xf32>
    %213 = math.exp %212 : vector<8x32xf32>
    %cst_44 = arith.constant 1.000000e+00 : f32
    %214 = vector.broadcast %cst_44 : f32 to vector<8x32xf32>
    %215 = arith.addf %214, %213 : vector<8x32xf32>
    %216 = arith.divf %214, %215 : vector<8x32xf32>
    %217 = vector.extract_strided_slice %205 {offsets = [0, 32], sizes = [8, 32], strides = [1, 1]} : vector<8x96xf32> to vector<8x32xf32>
    %218 = vector.extract_strided_slice %208 {offsets = [0, 32], sizes = [8, 32], strides = [1, 1]} : vector<8x96xf32> to vector<8x32xf32>
    %219 = arith.addf %217, %218 : vector<8x32xf32>
    %220 = arith.negf %219 : vector<8x32xf32>
    %221 = math.exp %220 : vector<8x32xf32>
    %cst_45 = arith.constant 1.000000e+00 : f32
    %222 = vector.broadcast %cst_45 : f32 to vector<8x32xf32>
    %223 = arith.addf %222, %221 : vector<8x32xf32>
    %224 = arith.divf %222, %223 : vector<8x32xf32>
    %225 = vector.extract_strided_slice %205 {offsets = [0, 64], sizes = [8, 32], strides = [1, 1]} : vector<8x96xf32> to vector<8x32xf32>
    %226 = vector.extract_strided_slice %208 {offsets = [0, 64], sizes = [8, 32], strides = [1, 1]} : vector<8x96xf32> to vector<8x32xf32>
    %227 = arith.mulf %216, %226 : vector<8x32xf32>
    %228 = arith.addf %225, %227 : vector<8x32xf32>
    %229 = math.tanh %228 : vector<8x32xf32>
    %cst_46 = arith.constant 1.000000e+00 : f32
    %230 = vector.broadcast %cst_46 : f32 to vector<8x32xf32>
    %231 = arith.subf %230, %224 : vector<8x32xf32>
    %232 = arith.mulf %231, %229 : vector<8x32xf32>
    %233 = arith.mulf %224, %204 : vector<8x32xf32>
    %234 = arith.addf %232, %233 : vector<8x32xf32>
    %235 = vector.extract_strided_slice %19 {offsets = [56, 0], sizes = [8, 96], strides = [1, 1]} : vector<64x96xf32> to vector<8x96xf32>
    %236 = arith.truncf %234 : vector<8x32xf32> to vector<8x32xbf16>
    %cst_47 = arith.constant dense<0.000000e+00> : vector<8x96xf32>
    %237 = tpu.matmul %236, %20, %cst_47 {dimension_numbers = #tpu.dot_dimension_numbers<[1], [0], [0], [1], [0, 0, 1, 1], [], []>} : vector<8x32xbf16>, vector<32x96xbf16>, vector<8x96xf32> -> vector<8x96xf32>
    %238 = arith.addf %237, %23 : vector<8x96xf32>
    %239 = vector.extract_strided_slice %235 {offsets = [0, 0], sizes = [8, 32], strides = [1, 1]} : vector<8x96xf32> to vector<8x32xf32>
    %240 = vector.extract_strided_slice %238 {offsets = [0, 0], sizes = [8, 32], strides = [1, 1]} : vector<8x96xf32> to vector<8x32xf32>
    %241 = arith.addf %239, %240 : vector<8x32xf32>
    %242 = arith.negf %241 : vector<8x32xf32>
    %243 = math.exp %242 : vector<8x32xf32>
    %cst_48 = arith.constant 1.000000e+00 : f32
    %244 = vector.broadcast %cst_48 : f32 to vector<8x32xf32>
    %245 = arith.addf %244, %243 : vector<8x32xf32>
    %246 = arith.divf %244, %245 : vector<8x32xf32>
    %247 = vector.extract_strided_slice %235 {offsets = [0, 32], sizes = [8, 32], strides = [1, 1]} : vector<8x96xf32> to vector<8x32xf32>
    %248 = vector.extract_strided_slice %238 {offsets = [0, 32], sizes = [8, 32], strides = [1, 1]} : vector<8x96xf32> to vector<8x32xf32>
    %249 = arith.addf %247, %248 : vector<8x32xf32>
    %250 = arith.negf %249 : vector<8x32xf32>
    %251 = math.exp %250 : vector<8x32xf32>
    %cst_49 = arith.constant 1.000000e+00 : f32
    %252 = vector.broadcast %cst_49 : f32 to vector<8x32xf32>
    %253 = arith.addf %252, %251 : vector<8x32xf32>
    %254 = arith.divf %252, %253 : vector<8x32xf32>
    %255 = vector.extract_strided_slice %235 {offsets = [0, 64], sizes = [8, 32], strides = [1, 1]} : vector<8x96xf32> to vector<8x32xf32>
    %256 = vector.extract_strided_slice %238 {offsets = [0, 64], sizes = [8, 32], strides = [1, 1]} : vector<8x96xf32> to vector<8x32xf32>
    %257 = arith.mulf %246, %256 : vector<8x32xf32>
    %258 = arith.addf %255, %257 : vector<8x32xf32>
    %259 = math.tanh %258 : vector<8x32xf32>
    %cst_50 = arith.constant 1.000000e+00 : f32
    %260 = vector.broadcast %cst_50 : f32 to vector<8x32xf32>
    %261 = arith.subf %260, %254 : vector<8x32xf32>
    %262 = arith.mulf %261, %259 : vector<8x32xf32>
    %263 = arith.mulf %254, %234 : vector<8x32xf32>
    %264 = arith.addf %262, %263 : vector<8x32xf32>
    %c0_51 = arith.constant 0 : index
    %c0_52 = arith.constant 0 : index
    %265 = vector.load %arg17[%c0_51, %c0_52] : memref<8x32xf32, #tpu.memory_space<vmem>>, vector<8x32xf32>
    tpu.vector_store %arg17[%c0_51, %c0_52], %264 {strides = array<i32>} : memref<8x32xf32, #tpu.memory_space<vmem>>, vector<8x32xf32>,
    %c0_i32_53 = arith.constant 0 : i32
    %266 = arith.cmpi eq, %arg1, %c0_i32_53 : i32
    %267 = arith.extui %266 : i1 to i32
    %c0_i32_54 = arith.constant 0 : i32
    %268 = arith.cmpi ne, %267, %c0_i32_54 : i32
    scf.if %268 {
      %c0_55 = arith.constant 0 : index
      %c0_56 = arith.constant 0 : index
      %269 = vector.load %arg10[%c0_55, %c0_56] : memref<32x96xbf16, #tpu.memory_space<vmem>>, vector<32x96xbf16>
      %c0_57 = arith.constant 0 : index
      %c0_58 = arith.constant 0 : index
      %270 = vector.load %arg11[%c0_57, %c0_58] : memref<1x96xf32, #tpu.memory_space<vmem>>, vector<1x96xf32>
      %271 = vector.shape_cast %270 : vector<1x96xf32> to vector<1x96xf32>
      %272 = vector.broadcast %271 : vector<1x96xf32> to vector<8x96xf32>
      %c0_59 = arith.constant 0 : index
      %c0_60 = arith.constant 0 : index
      %273 = vector.load %arg9[%c0_59, %c0_60] : memref<1x96xf32, #tpu.memory_space<vmem>>, vector<1x96xf32>
      %274 = vector.shape_cast %273 : vector<1x96xf32> to vector<1x96xf32>
      %275 = vector.broadcast %274 : vector<1x96xf32> to vector<8x96xf32>
      %c0_61 = arith.constant 0 : index
      %c0_62 = arith.constant 0 : index
      %276 = vector.load %arg12[%c0_61, %c0_62] : memref<32x32xbf16, #tpu.memory_space<vmem>>, vector<32x32xbf16>
      %c0_63 = arith.constant 0 : index
      %c0_64 = arith.constant 0 : index
      %277 = vector.load %arg13[%c0_63, %c0_64] : memref<1x32xf32, #tpu.memory_space<vmem>>, vector<1x32xf32>
      %278 = vector.shape_cast %277 : vector<1x32xf32> to vector<1x32xf32>
      %279 = vector.broadcast %278 : vector<1x32xf32> to vector<8x32xf32>
      %c0_65 = arith.constant 0 : index
      %c0_66 = arith.constant 0 : index
      %280 = vector.load %arg14[%c0_65, %c0_66] : memref<2x32xbf16, #tpu.memory_space<vmem>>, vector<2x32xbf16>
      %c0_67 = arith.constant 0 : index
      %c0_68 = arith.constant 0 : index
      %281 = vector.load %arg15[%c0_67, %c0_68] : memref<2x1xf32, #tpu.memory_space<vmem>>, vector<2x1xf32>
      %282 = arith.truncf %264 : vector<8x32xf32> to vector<8x32xbf16>
      %cst_69 = arith.constant dense<0.000000e+00> : vector<8x96xf32>
      %283 = tpu.matmul %282, %269, %cst_69 {dimension_numbers = #tpu.dot_dimension_numbers<[1], [0], [0], [1], [0, 0, 1, 1], [], []>} : vector<8x32xbf16>, vector<32x96xbf16>, vector<8x96xf32> -> vector<8x96xf32>
      %284 = arith.addf %283, %272 : vector<8x96xf32>
      %285 = vector.extract_strided_slice %275 {offsets = [0, 0], sizes = [8, 32], strides = [1, 1]} : vector<8x96xf32> to vector<8x32xf32>
      %286 = vector.extract_strided_slice %284 {offsets = [0, 0], sizes = [8, 32], strides = [1, 1]} : vector<8x96xf32> to vector<8x32xf32>
      %287 = arith.addf %285, %286 : vector<8x32xf32>
      %288 = arith.negf %287 : vector<8x32xf32>
      %289 = math.exp %288 : vector<8x32xf32>
      %cst_70 = arith.constant 1.000000e+00 : f32
      %290 = vector.broadcast %cst_70 : f32 to vector<8x32xf32>
      %291 = arith.addf %290, %289 : vector<8x32xf32>
      %292 = arith.divf %290, %291 : vector<8x32xf32>
      %293 = vector.extract_strided_slice %275 {offsets = [0, 32], sizes = [8, 32], strides = [1, 1]} : vector<8x96xf32> to vector<8x32xf32>
      %294 = vector.extract_strided_slice %284 {offsets = [0, 32], sizes = [8, 32], strides = [1, 1]} : vector<8x96xf32> to vector<8x32xf32>
      %295 = arith.addf %293, %294 : vector<8x32xf32>
      %296 = arith.negf %295 : vector<8x32xf32>
      %297 = math.exp %296 : vector<8x32xf32>
      %cst_71 = arith.constant 1.000000e+00 : f32
      %298 = vector.broadcast %cst_71 : f32 to vector<8x32xf32>
      %299 = arith.addf %298, %297 : vector<8x32xf32>
      %300 = arith.divf %298, %299 : vector<8x32xf32>
      %301 = vector.extract_strided_slice %275 {offsets = [0, 64], sizes = [8, 32], strides = [1, 1]} : vector<8x96xf32> to vector<8x32xf32>
      %302 = vector.extract_strided_slice %284 {offsets = [0, 64], sizes = [8, 32], strides = [1, 1]} : vector<8x96xf32> to vector<8x32xf32>
      %303 = arith.mulf %292, %302 : vector<8x32xf32>
      %304 = arith.addf %301, %303 : vector<8x32xf32>
      %305 = math.tanh %304 : vector<8x32xf32>
      %cst_72 = arith.constant 1.000000e+00 : f32
      %306 = vector.broadcast %cst_72 : f32 to vector<8x32xf32>
      %307 = arith.subf %306, %300 : vector<8x32xf32>
      %308 = arith.mulf %307, %305 : vector<8x32xf32>
      %309 = arith.mulf %300, %264 : vector<8x32xf32>
      %310 = arith.addf %308, %309 : vector<8x32xf32>
      %311 = arith.truncf %310 : vector<8x32xf32> to vector<8x32xbf16>
      %cst_73 = arith.constant dense<0.000000e+00> : vector<8x32xf32>
      %312 = tpu.matmul %311, %276, %cst_73 {dimension_numbers = #tpu.dot_dimension_numbers<[1], [0], [0], [1], [0, 0, 1, 1], [], []>} : vector<8x32xbf16>, vector<32x32xbf16>, vector<8x32xf32> -> vector<8x32xf32>
      %313 = arith.addf %312, %279 : vector<8x32xf32>
      %cst_74 = arith.constant 0.000000e+00 : f32
      %314 = vector.broadcast %cst_74 : f32 to vector<8x32xf32>
      %315 = arith.maximumf %313, %314 : vector<8x32xf32>
      %316 = arith.truncf %315 : vector<8x32xf32> to vector<8x32xbf16>
      %cst_75 = arith.constant dense<0.000000e+00> : vector<2x8xf32>
      %317 = tpu.matmul %280, %316, %cst_75 {dimension_numbers = #tpu.dot_dimension_numbers<[1], [1], [0], [0], [0, 0, 1, 0], [], []>} : vector<2x32xbf16>, vector<8x32xbf16>, vector<2x8xf32> -> vector<2x8xf32>
      %318 = vector.broadcast %281 : vector<2x1xf32> to vector<2x8xf32>
      %319 = arith.addf %317, %318 : vector<2x8xf32>
      %c0_76 = arith.constant 0 : index
      %c0_77 = arith.constant 0 : index
      %c0_78 = arith.constant 0 : index
      %320 = vector.load %arg16[%c0_76, %c0_77, %c0_78] : memref<3x2x8xf32, #tpu.memory_space<vmem>>, vector<1x2x8xf32>
      %321 = vector.shape_cast %320 : vector<1x2x8xf32> to vector<2x8xf32>
      %322 = vector.shape_cast %319 : vector<2x8xf32> to vector<1x2x8xf32>
      tpu.vector_store %arg16[%c0_76, %c0_77, %c0_78], %322 {strides = array<i32>} : memref<3x2x8xf32, #tpu.memory_space<vmem>>, vector<1x2x8xf32>,
      %323 = arith.truncf %310 : vector<8x32xf32> to vector<8x32xbf16>
      %cst_79 = arith.constant dense<0.000000e+00> : vector<8x96xf32>
      %324 = tpu.matmul %323, %269, %cst_79 {dimension_numbers = #tpu.dot_dimension_numbers<[1], [0], [0], [1], [0, 0, 1, 1], [], []>} : vector<8x32xbf16>, vector<32x96xbf16>, vector<8x96xf32> -> vector<8x96xf32>
      %325 = arith.addf %324, %272 : vector<8x96xf32>
      %326 = vector.extract_strided_slice %275 {offsets = [0, 0], sizes = [8, 32], strides = [1, 1]} : vector<8x96xf32> to vector<8x32xf32>
      %327 = vector.extract_strided_slice %325 {offsets = [0, 0], sizes = [8, 32], strides = [1, 1]} : vector<8x96xf32> to vector<8x32xf32>
      %328 = arith.addf %326, %327 : vector<8x32xf32>
      %329 = arith.negf %328 : vector<8x32xf32>
      %330 = math.exp %329 : vector<8x32xf32>
      %cst_80 = arith.constant 1.000000e+00 : f32
      %331 = vector.broadcast %cst_80 : f32 to vector<8x32xf32>
      %332 = arith.addf %331, %330 : vector<8x32xf32>
      %333 = arith.divf %331, %332 : vector<8x32xf32>
      %334 = vector.extract_strided_slice %275 {offsets = [0, 32], sizes = [8, 32], strides = [1, 1]} : vector<8x96xf32> to vector<8x32xf32>
      %335 = vector.extract_strided_slice %325 {offsets = [0, 32], sizes = [8, 32], strides = [1, 1]} : vector<8x96xf32> to vector<8x32xf32>
      %336 = arith.addf %334, %335 : vector<8x32xf32>
      %337 = arith.negf %336 : vector<8x32xf32>
      %338 = math.exp %337 : vector<8x32xf32>
      %cst_81 = arith.constant 1.000000e+00 : f32
      %339 = vector.broadcast %cst_81 : f32 to vector<8x32xf32>
      %340 = arith.addf %339, %338 : vector<8x32xf32>
      %341 = arith.divf %339, %340 : vector<8x32xf32>
      %342 = vector.extract_strided_slice %275 {offsets = [0, 64], sizes = [8, 32], strides = [1, 1]} : vector<8x96xf32> to vector<8x32xf32>
      %343 = vector.extract_strided_slice %325 {offsets = [0, 64], sizes = [8, 32], strides = [1, 1]} : vector<8x96xf32> to vector<8x32xf32>
      %344 = arith.mulf %333, %343 : vector<8x32xf32>
      %345 = arith.addf %342, %344 : vector<8x32xf32>
      %346 = math.tanh %345 : vector<8x32xf32>
      %cst_82 = arith.constant 1.000000e+00 : f32
      %347 = vector.broadcast %cst_82 : f32 to vector<8x32xf32>
      %348 = arith.subf %347, %341 : vector<8x32xf32>
      %349 = arith.mulf %348, %346 : vector<8x32xf32>
      %350 = arith.mulf %341, %310 : vector<8x32xf32>
      %351 = arith.addf %349, %350 : vector<8x32xf32>
      %352 = arith.truncf %351 : vector<8x32xf32> to vector<8x32xbf16>
      %cst_83 = arith.constant dense<0.000000e+00> : vector<8x32xf32>
      %353 = tpu.matmul %352, %276, %cst_83 {dimension_numbers = #tpu.dot_dimension_numbers<[1], [0], [0], [1], [0, 0, 1, 1], [], []>} : vector<8x32xbf16>, vector<32x32xbf16>, vector<8x32xf32> -> vector<8x32xf32>
      %354 = arith.addf %353, %279 : vector<8x32xf32>
      %cst_84 = arith.constant 0.000000e+00 : f32
      %355 = vector.broadcast %cst_84 : f32 to vector<8x32xf32>
      %356 = arith.maximumf %354, %355 : vector<8x32xf32>
      %357 = arith.truncf %356 : vector<8x32xf32> to vector<8x32xbf16>
      %cst_85 = arith.constant dense<0.000000e+00> : vector<2x8xf32>
      %358 = tpu.matmul %280, %357, %cst_85 {dimension_numbers = #tpu.dot_dimension_numbers<[1], [1], [0], [0], [0, 0, 1, 0], [], []>} : vector<2x32xbf16>, vector<8x32xbf16>, vector<2x8xf32> -> vector<2x8xf32>
      %359 = vector.broadcast %281 : vector<2x1xf32> to vector<2x8xf32>
      %360 = arith.addf %358, %359 : vector<2x8xf32>
      %c1 = arith.constant 1 : index
      %c0_86 = arith.constant 0 : index
      %c0_87 = arith.constant 0 : index
      %361 = vector.load %arg16[%c1, %c0_86, %c0_87] : memref<3x2x8xf32, #tpu.memory_space<vmem>>, vector<1x2x8xf32>
      %362 = vector.shape_cast %361 : vector<1x2x8xf32> to vector<2x8xf32>
      %363 = vector.shape_cast %360 : vector<2x8xf32> to vector<1x2x8xf32>
      tpu.vector_store %arg16[%c1, %c0_86, %c0_87], %363 {strides = array<i32>} : memref<3x2x8xf32, #tpu.memory_space<vmem>>, vector<1x2x8xf32>,
      %364 = arith.truncf %351 : vector<8x32xf32> to vector<8x32xbf16>
      %cst_88 = arith.constant dense<0.000000e+00> : vector<8x96xf32>
      %365 = tpu.matmul %364, %269, %cst_88 {dimension_numbers = #tpu.dot_dimension_numbers<[1], [0], [0], [1], [0, 0, 1, 1], [], []>} : vector<8x32xbf16>, vector<32x96xbf16>, vector<8x96xf32> -> vector<8x96xf32>
      %366 = arith.addf %365, %272 : vector<8x96xf32>
      %367 = vector.extract_strided_slice %275 {offsets = [0, 0], sizes = [8, 32], strides = [1, 1]} : vector<8x96xf32> to vector<8x32xf32>
      %368 = vector.extract_strided_slice %366 {offsets = [0, 0], sizes = [8, 32], strides = [1, 1]} : vector<8x96xf32> to vector<8x32xf32>
      %369 = arith.addf %367, %368 : vector<8x32xf32>
      %370 = arith.negf %369 : vector<8x32xf32>
      %371 = math.exp %370 : vector<8x32xf32>
      %cst_89 = arith.constant 1.000000e+00 : f32
      %372 = vector.broadcast %cst_89 : f32 to vector<8x32xf32>
      %373 = arith.addf %372, %371 : vector<8x32xf32>
      %374 = arith.divf %372, %373 : vector<8x32xf32>
      %375 = vector.extract_strided_slice %275 {offsets = [0, 32], sizes = [8, 32], strides = [1, 1]} : vector<8x96xf32> to vector<8x32xf32>
      %376 = vector.extract_strided_slice %366 {offsets = [0, 32], sizes = [8, 32], strides = [1, 1]} : vector<8x96xf32> to vector<8x32xf32>
      %377 = arith.addf %375, %376 : vector<8x32xf32>
      %378 = arith.negf %377 : vector<8x32xf32>
      %379 = math.exp %378 : vector<8x32xf32>
      %cst_90 = arith.constant 1.000000e+00 : f32
      %380 = vector.broadcast %cst_90 : f32 to vector<8x32xf32>
      %381 = arith.addf %380, %379 : vector<8x32xf32>
      %382 = arith.divf %380, %381 : vector<8x32xf32>
      %383 = vector.extract_strided_slice %275 {offsets = [0, 64], sizes = [8, 32], strides = [1, 1]} : vector<8x96xf32> to vector<8x32xf32>
      %384 = vector.extract_strided_slice %366 {offsets = [0, 64], sizes = [8, 32], strides = [1, 1]} : vector<8x96xf32> to vector<8x32xf32>
      %385 = arith.mulf %374, %384 : vector<8x32xf32>
      %386 = arith.addf %383, %385 : vector<8x32xf32>
      %387 = math.tanh %386 : vector<8x32xf32>
      %cst_91 = arith.constant 1.000000e+00 : f32
      %388 = vector.broadcast %cst_91 : f32 to vector<8x32xf32>
      %389 = arith.subf %388, %382 : vector<8x32xf32>
      %390 = arith.mulf %389, %387 : vector<8x32xf32>
      %391 = arith.mulf %382, %351 : vector<8x32xf32>
      %392 = arith.addf %390, %391 : vector<8x32xf32>
      %393 = arith.truncf %392 : vector<8x32xf32> to vector<8x32xbf16>
      %cst_92 = arith.constant dense<0.000000e+00> : vector<8x32xf32>
      %394 = tpu.matmul %393, %276, %cst_92 {dimension_numbers = #tpu.dot_dimension_numbers<[1], [0], [0], [1], [0, 0, 1, 1], [], []>} : vector<8x32xbf16>, vector<32x32xbf16>, vector<8x32xf32> -> vector<8x32xf32>
      %395 = arith.addf %394, %279 : vector<8x32xf32>
      %cst_93 = arith.constant 0.000000e+00 : f32
      %396 = vector.broadcast %cst_93 : f32 to vector<8x32xf32>
      %397 = arith.maximumf %395, %396 : vector<8x32xf32>
      %398 = arith.truncf %397 : vector<8x32xf32> to vector<8x32xbf16>
      %cst_94 = arith.constant dense<0.000000e+00> : vector<2x8xf32>
      %399 = tpu.matmul %280, %398, %cst_94 {dimension_numbers = #tpu.dot_dimension_numbers<[1], [1], [0], [0], [0, 0, 1, 0], [], []>} : vector<2x32xbf16>, vector<8x32xbf16>, vector<2x8xf32> -> vector<2x8xf32>
      %400 = vector.broadcast %281 : vector<2x1xf32> to vector<2x8xf32>
      %401 = arith.addf %399, %400 : vector<2x8xf32>
      %c2 = arith.constant 2 : index
      %c0_95 = arith.constant 0 : index
      %c0_96 = arith.constant 0 : index
      %402 = vector.load %arg16[%c2, %c0_95, %c0_96] : memref<3x2x8xf32, #tpu.memory_space<vmem>>, vector<1x2x8xf32>
      %403 = vector.shape_cast %402 : vector<1x2x8xf32> to vector<2x8xf32>
      %404 = vector.shape_cast %401 : vector<2x8xf32> to vector<1x2x8xf32>
      tpu.vector_store %arg16[%c2, %c0_95, %c0_96], %404 {strides = array<i32>} : memref<3x2x8xf32, #tpu.memory_space<vmem>>, vector<1x2x8xf32>,
    } else {
    }
    return
  }
  func.func @transform_0(%arg0: i32, %arg1: i32) -> (i32, i32, i32) {
    %c0_i32 = arith.constant 0 : i32
    %c0_i32_0 = arith.constant 0 : i32
    return %arg1, %arg0, %c0_i32 : i32, i32, i32
  }
  func.func @transform_1(%arg0: i32, %arg1: i32) -> (i32, i32) {
    %c0_i32 = arith.constant 0 : i32
    %c0_i32_0 = arith.constant 0 : i32
    %c0_i32_1 = arith.constant 0 : i32
    return %c0_i32, %c0_i32_0 : i32, i32
  }
  func.func @transform_2(%arg0: i32, %arg1: i32) -> (i32, i32) {
    %c0_i32 = arith.constant 0 : i32
    %c0_i32_0 = arith.constant 0 : i32
    %c0_i32_1 = arith.constant 0 : i32
    return %c0_i32, %c0_i32_0 : i32, i32
  }
  func.func @transform_3(%arg0: i32, %arg1: i32) -> (i32, i32) {
    %c0_i32 = arith.constant 0 : i32
    %c0_i32_0 = arith.constant 0 : i32
    %c0_i32_1 = arith.constant 0 : i32
    return %c0_i32, %c0_i32_0 : i32, i32
  }
  func.func @transform_4(%arg0: i32, %arg1: i32) -> (i32, i32) {
    %c0_i32 = arith.constant 0 : i32
    %c0_i32_0 = arith.constant 0 : i32
    %c0_i32_1 = arith.constant 0 : i32
    return %c0_i32, %c0_i32_0 : i32, i32
  }
  func.func @transform_5(%arg0: i32, %arg1: i32) -> (i32, i32) {
    %c0_i32 = arith.constant 0 : i32
    %c0_i32_0 = arith.constant 0 : i32
    %c0_i32_1 = arith.constant 0 : i32
    return %c0_i32, %c0_i32_0 : i32, i32
  }
  func.func @transform_6(%arg0: i32, %arg1: i32) -> (i32, i32) {
    %c0_i32 = arith.constant 0 : i32
    %c0_i32_0 = arith.constant 0 : i32
    %c0_i32_1 = arith.constant 0 : i32
    return %c0_i32, %c0_i32_0 : i32, i32
  }
  func.func @transform_7(%arg0: i32, %arg1: i32) -> (i32, i32) {
    %c0_i32 = arith.constant 0 : i32
    %c0_i32_0 = arith.constant 0 : i32
    %c0_i32_1 = arith.constant 0 : i32
    return %c0_i32, %c0_i32_0 : i32, i32
  }
  func.func @transform_8(%arg0: i32, %arg1: i32) -> (i32, i32) {
    %c0_i32 = arith.constant 0 : i32
    %c0_i32_0 = arith.constant 0 : i32
    %c0_i32_1 = arith.constant 0 : i32
    return %c0_i32, %c0_i32_0 : i32, i32
  }
  func.func @transform_9(%arg0: i32, %arg1: i32) -> (i32, i32) {
    %c0_i32 = arith.constant 0 : i32
    %c0_i32_0 = arith.constant 0 : i32
    %c0_i32_1 = arith.constant 0 : i32
    return %c0_i32, %c0_i32_0 : i32, i32
  }
  func.func @transform_10(%arg0: i32, %arg1: i32) -> (i32, i32) {
    %c0_i32 = arith.constant 0 : i32
    %c0_i32_0 = arith.constant 0 : i32
    %c0_i32_1 = arith.constant 0 : i32
    return %c0_i32, %c0_i32_0 : i32, i32
  }
  func.func @transform_11(%arg0: i32, %arg1: i32) -> (i32, i32) {
    %c0_i32 = arith.constant 0 : i32
    %c0_i32_0 = arith.constant 0 : i32
    %c0_i32_1 = arith.constant 0 : i32
    return %c0_i32, %c0_i32_0 : i32, i32
  }
  func.func @transform_12(%arg0: i32, %arg1: i32) -> (i32, i32) {
    %c0_i32 = arith.constant 0 : i32
    %c0_i32_0 = arith.constant 0 : i32
    %c0_i32_1 = arith.constant 0 : i32
    return %c0_i32, %c0_i32_0 : i32, i32
  }
  func.func @transform_13(%arg0: i32, %arg1: i32) -> (i32, i32) {
    %c0_i32 = arith.constant 0 : i32
    %c0_i32_0 = arith.constant 0 : i32
    %c0_i32_1 = arith.constant 0 : i32
    return %c0_i32, %c0_i32_0 : i32, i32
  }
  func.func @transform_14(%arg0: i32, %arg1: i32) -> (i32, i32, i32) {
    %c0_i32 = arith.constant 0 : i32
    %c0_i32_0 = arith.constant 0 : i32
    %c0_i32_1 = arith.constant 0 : i32
    return %c0_i32, %c0_i32_0, %arg0 : i32, i32, i32
  }
}

</mosaic_0001>

<bundles_post_ra>
// kernel: forward.1
= control target key start
LH: loop header
LB: loop body
LE: loop exit
PB: predicated region body
PF: predicated region fallthrough
CT: control target
= control target key end

     0   :  { %vm95_vm0 = vcmask 1043456   ;;  %vm82_vm1 = vcmask 64512   ;;  %vm52_vm2 = vcmask 261120   ;;  %v1802_v5 = vmov 0.0   ;;  %s1804_s30 = smov 64   ;;  %s1806_s16 = smov 32   ;;  %s2219_s1 = inlined_call_operand.vmem [shape: bf16[8,32], index: 1, kind: input, shape index: {}]   ;;  %s2220_s0 = inlined_call_operand.vmem [shape: bf16[8,8,8], index: 0, kind: input, shape index: {}]   ;;  %s2221_s5 = inlined_call_operand.vmem [shape: bf16[32,96], index: 5, kind: input, shape index: {}]   ;;  %s2222_s3 = inlined_call_operand.vmem [shape: bf16[32,96], index: 3, kind: input, shape index: {}]   ;;  %s2223_s2 = inlined_call_operand.vmem [shape: f32[1,32], index: 2, kind: input, shape index: {}]   ;;  %s2224_s6 = inlined_call_operand.vmem [shape: f32[1,96], index: 6, kind: input, shape index: {}]   ;;  %s2225_s4 = inlined_call_operand.vmem [shape: f32[1,96], index: 4, kind: input, shape index: {}]   ;;  %s2226_s8 = inlined_call_operand.vmem [shape: bf16[32,96], index: 8, kind: input, shape index: {}]   ;;  %s2227_s9 = inlined_call_operand.vmem [shape: f32[1,96], index: 9, kind: input, shape index: {}]   ;;  %s2228_s7 = inlined_call_operand.vmem [shape: f32[1,96], index: 7, kind: input, shape index: {}]   ;;  %s2229_s10 = inlined_call_operand.vmem [shape: bf16[32,32], index: 10, kind: input, shape index: {}]   ;;  %s2230_s11 = inlined_call_operand.vmem [shape: f32[1,32], index: 11, kind: input, shape index: {}]   ;;  %s2231_s12 = inlined_call_operand.vmem [shape: bf16[2,32], index: 12, kind: input, shape index: {}]   ;;  %s2232_s13 = inlined_call_operand.vmem [shape: f32[2,1], index: 13, kind: input, shape index: {}]   ;;  %s2233_s14 = inlined_call_operand.vmem [shape: f32[3,2,8], index: 14, kind: output, shape index: {}]  }
   0x1   :  { %v74_v0 = vld [vmem:[%s2219_s1] sm:$0xf]  ;;  %v1725_v3 = vld [vmem:[%s2220_s0 + $0x8] sm:$0xff]   ;;  %v1726_v4 = vld [vmem:[%s2220_s0 + $0x10] sm:$0xff]   ;;  %53 = vst.msk [vmem:[#allocation2] sm:$0xff] %vm52_vm2, %v1802_v5  ;;  %vm1803_vm3 = vmmov 0  }
   0x2   :  { %1715 = vmatprep.subr.msk.bf16.mxu0 %vm95_vm0, %v74_v0  ;;  %v97_v1 = vsel %vm95_vm0, %v74_v0, 0  ;;  %v1724_v2 = vld [vmem:[%s2220_s0] sm:$0xff]   ;;  %v1903_v6 = vld [vmem:[%s2221_s5 + $0x8] sm:$0xff]   ;;  %v1727_v8 = vld [vmem:[%s2220_s0 + $0x18] sm:$0xff]   ;;  %vm1122_vm4 = vcmask 58368  }
   0x3   :  { %1564 = vmatpush3.bf16.msra.mxu0 %v97_v1  ;;  %1565 = vmatprep.mubr.msk.bf16.mxu0 %vm82_vm1, %v1724_v2  ;;  %v1910_v7 = vld [vmem:[%s2221_s5] sm:$0xff]   ;;  %v1730_v11 = vld [vmem:[%s2222_s3 + $0x8] sm:$0xff]  }
   0x4   :  { %1585 = vmatprep.subr.bf16.mxu0 %v1802_v5  ;;  %1573 = vmatprep.subr.bf16.mxu1 %v1730_v11  ;;  %v1731_v12 = vld [vmem:[%s2222_s3] sm:$0xff]  }
   0x5   :  { %1574 = vmatpush3.bf16.msra.mxu1 %v1730_v11  ;;  %v1452_v15 = vld [vmem:[%s2223_s2] ss:$0 sm:$0xff] }
   0x6   :  { %1566 = vmatmul.mubr.msk.bf16.vlgmr.msra.gmra.mxu0 %vm82_vm1, %v1725_v3  ;;  %1575 = vmatprep.subr.bf16.mxu1 %v1731_v12  ;;  %v1947_v36 = vld [vmem:[%s2224_s6] ss:$0 sm:$0xff] }
   0x7   :  { %1569 = vmatprep.mubr.msk.bf16.mxu0 %vm82_vm1, %v1726_v4  ;;  %1586 = vmatpush3.bf16.msra.mxu0 %v1903_v6  ;;  %v1962_v48 = vld [vmem:[%s2225_s4] ss:$0 sm:$0xff]  ;;  %s1805_s4 = smov 96  }
   0x8   :  { %1587 = vmatprep.subr.bf16.mxu0 %v1802_v5  ;;  %v1921_v9 = vld [vmem:[#allocation2] sm:$0xff] }
   0x9   :  { %v289_v10 = vpack.c.bf16 %v1921_v9, %v1921_v9  ;;  %1576 = vmatpush3.bf16.msra.mxu1 %v1731_v12 }
   0xa   :  { %1593 = vmatprep.subr.bf16.mxu1 %v1802_v5 }
   0xb   :  { %1588 = vmatpush3.bf16.msra.mxu0 %v1910_v7 }
   0xc   :  { %1601 = vmatprep.subr.bf16.mxu0 %v1802_v5 }
   0xe   :  { %1570 = vmatmul.mubr.msk.bf16.gmra.mxu0 %vm82_vm1, %v1727_v8 }
   0xf   :  { %1589 = vmatprep.mubr.msk.bf16.mxu0 %vm1803_vm3, %v1802_v5 }
  0x16   :  { %1590 = vmatmul.mubr.msk.bf16.vlgmr.msra.gmra.mxu0 %vm52_vm2, %v289_v10 }
  0x17   :  { %1602 = vmatpush3.bf16.msra.mxu0 %v1903_v6  ;;  %1605 = vmatprep.mubr.msk.bf16.mxu0 %vm1803_vm3, %v1802_v5 }
  0x18   :  { %1603 = vmatprep.subr.bf16.mxu0 %v1802_v5 }
  0x1b   :  { %1604 = vmatpush3.bf16.msra.mxu0 %v1910_v7 }
  0x1c   :  { %1617 = vmatprep.subr.bf16.mxu0 %v1802_v5 }
  0xc6   :  { %v1567_v13 = vpop.f32.mrf.mxu0 }
  0xc7   :  { %v142_v19 = vadd.f32 %v1567_v13, %v1452_v15 }
  0xc8   :  { %v133_v14 = vpop.f32.mrf.mxu0 }
  0xc9   :  { %v134_v17 = vadd.f32 %v1452_v15, %v133_v14  ;;  %v166_v26 = vmax.f32 %v142_v19, 0.0 }
  0xca   :  { %v1568_v16 = vpop.f32.mrf.mxu0 }
  0xcb   :  { %v145_v18 = vadd.f32 %v1568_v16, %v1452_v15  ;;  %v164_v24 = vmax.f32 %v134_v17, 0.0 }
  0xcc   :  { %v136_v20 = vpop.f32.mrf.mxu0 }
  0xcd   :  { %v137_v21 = vadd.f32 %v1452_v15, %v136_v20  ;;  %v167_v22 = vmax.f32 %v145_v18, 0.0 }
  0xce   :  { %v1571_v23 = vpop.f32.mrf.mxu0 }
  0xcf   :  { %v165_v25 = vmax.f32 %v137_v21, 0.0  ;;  %v158_v27 = vadd.f32 %v1571_v23, %v1452_v15  ;;  %v173_v31 = vpack.c.bf16 %v167_v22, %v166_v26 }
  0xd0   :  { %v149_v28 = vpop.f32.mrf.mxu0 }
  0xd1   :  { %v172_v29 = vpack.c.bf16 %v165_v25, %v164_v24  ;;  %v150_v30 = vadd.f32 %v1452_v15, %v149_v28  ;;  %v170_v34 = vmax.f32 %v158_v27, 0.0 }
  0xd2   :  { %v1572_v32 = vpop.f32.mrf.mxu0 }
  0xd3   :  { %1577 = vmatprep.mubr.msk.bf16.mxu1 %vm52_vm2, %v172_v29  ;;  %v161_v33 = vadd.f32 %v1572_v32, %v1452_v15  ;;  %v168_v37 = vmax.f32 %v150_v30, 0.0 }
  0xd4   :  { %1578 = vmatmul.mubr.msk.bf16.vlgmr.msra.gmra.mxu1 %vm52_vm2, %v173_v31  ;;  %v152_v35 = vpop.f32.mrf.mxu0 }
  0xd5   :  { %v171_v38 = vmax.f32 %v161_v33, 0.0  ;;  %v153_v39 = vadd.f32 %v1452_v15, %v152_v35  ;;  %1594 = vmatpush3.bf16.msra.mxu1 %v1903_v6 }
  0xd6   :  { %v339_v40 = vpop.f32.mrf.mxu0  ;;  %1595 = vmatprep.subr.bf16.mxu1 %v1802_v5 }
  0xd7   :  { %v169_v41 = vmax.f32 %v153_v39, 0.0  ;;  %v340_v42 = vadd.f32 %v1947_v36, %v339_v40  ;;  %v175_v43 = vpack.c.bf16 %v171_v38, %v170_v34 }
  0xd8   :  { %v1591_v44 = vpop.f32.mrf.mxu0 }
  0xd9   :  { %v174_v45 = vpack.c.bf16 %v169_v41, %v168_v37  ;;  %353 = vrot.lane.b32.xlu0 %v340_v42, %s1804_s30  ;;  %1596 = vmatpush3.bf16.msra.mxu1 %v1910_v7 }
  0xda   :  { %v342_v46 = vpop.f32.mrf.mxu0  ;;  %1609 = vmatprep.subr.bf16.mxu1 %v1802_v5 }
  0xdb   :  { %1581 = vmatprep.mubr.msk.bf16.mxu1 %vm52_vm2, %v174_v45 }
  0xdc   :  { %1582 = vmatmul.mubr.msk.bf16.gmra.mxu1 %vm52_vm2, %v175_v43  ;;  %v1592_v47 = vpop.f32.mrf.mxu0 }
  0xdd   :  { %1597 = vmatprep.mubr.msk.bf16.mxu1 %vm1803_vm3, %v1802_v5 }
 0x14b   :  { %v354_v3 = vpop.permute.xlu0 %353 }
 0x194   :  { %v1579_v49 = vpop.f32.mrf.mxu1 }
 0x195   :  { %v1965_v50 = vadd.f32 %v1579_v49, %v1962_v48 }
 0x196   :  { %v246_v51 = vpop.f32.mrf.mxu1 }
 0x197   :  { %v247_v52 = vadd.f32 %v1962_v48, %v246_v51 }
 0x198   :  { %v1580_v53 = vpop.f32.mrf.mxu1 }
 0x199   :  { %v345_v54 = vadd.f32 %v340_v42, %v247_v52  ;;  %v1969_v55 = vadd.f32 %v1580_v53, %v1962_v48 }
 0x19a   :  { %v249_v56 = vpop.f32.mrf.mxu1 }
 0x19b   :  { %v1468_v57 = vmul.f32 -1.442695, %v345_v54  ;;  %v250_v58 = vadd.f32 %v1962_v48, %v249_v56 }
 0x19c   :  { %v1583_v59 = vpop.f32.mrf.mxu1 }
 0x19d   :  { %1736 = vpow2.f32 %v1468_v57  ;;  %v1973_v60 = vadd.f32 %v1583_v59, %v1962_v48 }
 0x19e   :  { %v262_v61 = vpop.f32.mrf.mxu1 }
 0x19f   :  { %v1976_v62 = vadd.f32 %v1962_v48, %v262_v61 }
 0x1a0   :  { %v1584_v63 = vpop.f32.mrf.mxu1 }
 0x1a1   :  { %v1979_v0 = vadd.f32 %v1584_v63, %v1962_v48 }
 0x1aa   :  { %v1737_v1 = vpop.eup %1736 }
 0x1ab   :  { %v349_v2 = vadd.f32 1.0, %v1737_v1 }
 0x1ad   :  { %1738 = vrcp.f32 %v349_v2 }
 0x1ba   :  { %v1739_v4 = vpop.eup %1738 }
 0x1bb   :  { %v356_v8 = vmul.f32 %v1739_v4, %v354_v3  ;;  %v363_v14 = vsub.f32 1.0, %v1739_v4 }
 0x1bd   :  { %358 = vrot.lane.b32.xlu0 %v356_v8, %s1804_s30 }
 0x22f   :  { %v359_v10 = vpop.permute.xlu0 %358 }
 0x230   :  { %v361_v11 = vadd.f32 %v359_v10, %v247_v52 }
 0x232   :  { %1740 = vtanh.f32 %v361_v11 }
 0x23f   :  { %v1741_v12 = vpop.eup %1740 }
 0x240   :  { %365 = vrot.lane.b32.xlu1 %v1741_v12, %s1805_s4 }
 0x244   :  { %370 = vrot.lane.b32.xlu1 %v1921_v9, %s1806_s16  ;;  %v1992_v9 = vpop.f32.mrf.mxu1 }
 0x2b2   :  { %v366_v13 = vpop.permute.xlu1 %365 }
 0x2b3   :  { %v368_v16 = vmul.f32 %v366_v13, %v363_v14 }
 0x2b6   :  { %v371_v15 = vpop.permute.xlu1 %370 }
 0x2b7   :  { %v373_v17 = vmul.f32 %v1739_v4, %v371_v15 }
 0x2b9   :  { %v374_v18 = vadd.f32 %v373_v17, %v368_v16 }
 0x2bb   :  { %v375_v19 = vpack.c.bf16 %v374_v18, %v374_v18 }
 0x2bd   :  { %377 = vrot.lane.b32.xlu0 %v375_v19, %s1805_s4 }
 0x32f   :  { %v378_v20 = vpop.permute.xlu0 %377 }
 0x330   :  { %1598 = vmatmul.mubr.msk.bf16.vlgmr.msra.gmra.mxu1 %vm52_vm2, %v378_v20 }
 0x331   :  { %1610 = vmatpush3.bf16.msra.mxu1 %v1903_v6  ;;  %1613 = vmatprep.mubr.msk.bf16.mxu1 %vm1803_vm3, %v1802_v5 }
 0x332   :  { %1611 = vmatprep.subr.bf16.mxu1 %v1802_v5 }
 0x335   :  { %1612 = vmatpush3.bf16.msra.mxu1 %v1910_v7 }
 0x336   :  { %1625 = vmatprep.subr.bf16.mxu1 %v1802_v5 }
 0x3f0   :  { %v416_v21 = vpop.f32.mrf.mxu1 }
 0x3f1   :  { %v417_v22 = vadd.f32 %v1947_v36, %v416_v21 }
 0x3f2   :  { %v1599_v23 = vpop.f32.mrf.mxu1 }
 0x3f3   :  { %430 = vrot.lane.b32.xlu1 %v417_v22, %s1804_s30  ;;  %v422_v26 = vadd.f32 %v417_v22, %v250_v58 }
 0x3f4   :  { %v419_v24 = vpop.f32.mrf.mxu1 }
 0x3f5   :  { %v1470_v27 = vmul.f32 -1.442695, %v422_v26 }
 0x3f6   :  { %v1600_v25 = vpop.f32.mrf.mxu1 }
 0x3f7   :  { %1742 = vpow2.f32 %v1470_v27 }
 0x404   :  { %v1743_v28 = vpop.eup %1742 }
 0x405   :  { %v426_v29 = vadd.f32 1.0, %v1743_v28 }
 0x407   :  { %1744 = vrcp.f32 %v426_v29 }
 0x414   :  { %v1745_v30 = vpop.eup %1744 }
 0x415   :  { %v440_v37 = vsub.f32 1.0, %v1745_v30  ;;  %v446_v39 = vmul.f32 %v1745_v30, %v374_v18 }
 0x465   :  { %v431_v31 = vpop.permute.xlu1 %430 }
 0x466   :  { %v433_v32 = vmul.f32 %v1745_v30, %v431_v31 }
 0x468   :  { %435 = vrot.lane.b32.xlu0 %v433_v32, %s1804_s30 }
 0x4da   :  { %v436_v33 = vpop.permute.xlu0 %435 }
 0x4db   :  { %v438_v34 = vadd.f32 %v436_v33, %v250_v58 }
 0x4dd   :  { %1746 = vtanh.f32 %v438_v34 }
 0x4ea   :  { %v1747_v35 = vpop.eup %1746 }
 0x4eb   :  { %442 = vrot.lane.b32.xlu1 %v1747_v35, %s1805_s4 }
 0x55d   :  { %v443_v38 = vpop.permute.xlu1 %442 }
 0x55e   :  { %v445_v40 = vmul.f32 %v443_v38, %v440_v37 }
 0x560   :  { %v447_v41 = vadd.f32 %v446_v39, %v445_v40 }
 0x562   :  { %v448_v42 = vpack.c.bf16 %v447_v41, %v447_v41 }
 0x564   :  { %450 = vrot.lane.b32.xlu0 %v448_v42, %s1805_s4 }
 0x5d6   :  { %v451_v43 = vpop.permute.xlu0 %450 }
 0x5d7   :  { %1606 = vmatmul.mubr.msk.bf16.vlgmr.msra.gmra.mxu0 %vm52_vm2, %v451_v43 }
 0x5d8   :  { %1618 = vmatpush3.bf16.msra.mxu0 %v1903_v6  ;;  %1621 = vmatprep.mubr.msk.bf16.mxu0 %vm1803_vm3, %v1802_v5 }
 0x5d9   :  { %1619 = vmatprep.subr.bf16.mxu0 %v1802_v5 }
 0x5dc   :  { %1620 = vmatpush3.bf16.msra.mxu0 %v1910_v7 }
 0x5dd   :  { %1633 = vmatprep.subr.bf16.mxu0 %v1802_v5 }
 0x697   :  { %v489_v44 = vpop.f32.mrf.mxu0 }
 0x698   :  { %v490_v45 = vadd.f32 %v1947_v36, %v489_v44 }
 0x699   :  { %v1607_v46 = vpop.f32.mrf.mxu0 }
 0x69a   :  { %503 = vrot.lane.b32.xlu1 %v490_v45, %s1804_s30  ;;  %v495_v51 = vadd.f32 %v490_v45, %v1965_v50 }
 0x69b   :  { %v492_v47 = vpop.f32.mrf.mxu0 }
 0x69c   :  { %v1472_v52 = vmul.f32 -1.442695, %v495_v51 }
 0x69d   :  { %v1608_v49 = vpop.f32.mrf.mxu0 }
 0x69e   :  { %1748 = vpow2.f32 %v1472_v52 }
 0x6ab   :  { %v1749_v53 = vpop.eup %1748 }
 0x6ac   :  { %v499_v54 = vadd.f32 1.0, %v1749_v53 }
 0x6ae   :  { %1750 = vrcp.f32 %v499_v54 }
 0x6bb   :  { %v1751_v56 = vpop.eup %1750 }
 0x6bc   :  { %v513_v1 = vsub.f32 1.0, %v1751_v56  ;;  %v519_v3 = vmul.f32 %v1751_v56, %v447_v41 }
 0x70c   :  { %v504_v57 = vpop.permute.xlu1 %503 }
 0x70d   :  { %v506_v58 = vmul.f32 %v1751_v56, %v504_v57 }
 0x70f   :  { %508 = vrot.lane.b32.xlu0 %v506_v58, %s1804_s30 }
 0x781   :  { %v509_v59 = vpop.permute.xlu0 %508 }
 0x782   :  { %v511_v61 = vadd.f32 %v509_v59, %v1965_v50 }
 0x784   :  { %1752 = vtanh.f32 %v511_v61 }
 0x791   :  { %v1753_v63 = vpop.eup %1752 }
 0x792   :  { %515 = vrot.lane.b32.xlu1 %v1753_v63, %s1805_s4 }
 0x804   :  { %v516_v2 = vpop.permute.xlu1 %515 }
 0x805   :  { %v518_v4 = vmul.f32 %v516_v2, %v513_v1 }
 0x807   :  { %v520_v8 = vadd.f32 %v519_v3, %v518_v4 }
 0x809   :  { %v521_v10 = vpack.c.bf16 %v520_v8, %v520_v8 }
 0x80b   :  { %523 = vrot.lane.b32.xlu0 %v521_v10, %s1805_s4 }
 0x87d   :  { %v524_v11 = vpop.permute.xlu0 %523 }
 0x87e   :  { %1614 = vmatmul.mubr.msk.bf16.vlgmr.msra.gmra.mxu1 %vm52_vm2, %v524_v11 }
 0x87f   :  { %1626 = vmatpush3.bf16.msra.mxu1 %v1903_v6  ;;  %1629 = vmatprep.mubr.msk.bf16.mxu1 %vm1803_vm3, %v1802_v5 }
 0x880   :  { %1627 = vmatprep.subr.bf16.mxu1 %v1802_v5 }
 0x883   :  { %1628 = vmatpush3.bf16.msra.mxu1 %v1910_v7 }
 0x884   :  { %1641 = vmatprep.subr.bf16.mxu1 %v1802_v5 }
 0x93e   :  { %v562_v50 = vpop.f32.mrf.mxu1 }
 0x93f   :  { %v563_v12 = vadd.f32 %v1947_v36, %v562_v50 }
 0x940   :  { %v1615_v13 = vpop.f32.mrf.mxu1 }
 0x941   :  { %576 = vrot.lane.b32.xlu1 %v563_v12, %s1804_s30  ;;  %v568_v16 = vadd.f32 %v563_v12, %v1969_v55 }
 0x942   :  { %v565_v14 = vpop.f32.mrf.mxu1 }
 0x943   :  { %v1474_v17 = vmul.f32 -1.442695, %v568_v16 }
 0x944   :  { %v1616_v15 = vpop.f32.mrf.mxu1 }
 0x945   :  { %1754 = vpow2.f32 %v1474_v17 }
 0x952   :  { %v1755_v18 = vpop.eup %1754 }
 0x953   :  { %v572_v19 = vadd.f32 1.0, %v1755_v18 }
 0x955   :  { %1756 = vrcp.f32 %v572_v19 }
 0x962   :  { %v1757_v20 = vpop.eup %1756 }
 0x963   :  { %v586_v26 = vsub.f32 1.0, %v1757_v20  ;;  %v592_v28 = vmul.f32 %v1757_v20, %v520_v8 }
 0x9b3   :  { %v577_v21 = vpop.permute.xlu1 %576 }
 0x9b4   :  { %v579_v22 = vmul.f32 %v1757_v20, %v577_v21 }
 0x9b6   :  { %581 = vrot.lane.b32.xlu0 %v579_v22, %s1804_s30 }
 0xa28   :  { %v582_v23 = vpop.permute.xlu0 %581 }
 0xa29   :  { %v584_v24 = vadd.f32 %v582_v23, %v1969_v55 }
 0xa2b   :  { %1758 = vtanh.f32 %v584_v24 }
 0xa38   :  { %v1759_v25 = vpop.eup %1758 }
 0xa39   :  { %588 = vrot.lane.b32.xlu1 %v1759_v25, %s1805_s4 }
 0xaab   :  { %v589_v27 = vpop.permute.xlu1 %588 }
 0xaac   :  { %v591_v29 = vmul.f32 %v589_v27, %v586_v26 }
 0xaae   :  { %v593_v30 = vadd.f32 %v592_v28, %v591_v29 }
 0xab0   :  { %v594_v31 = vpack.c.bf16 %v593_v30, %v593_v30 }
 0xab2   :  { %596 = vrot.lane.b32.xlu0 %v594_v31, %s1805_s4 }
 0xb24   :  { %v597_v32 = vpop.permute.xlu0 %596 }
 0xb25   :  { %1622 = vmatmul.mubr.msk.bf16.vlgmr.msra.gmra.mxu0 %vm52_vm2, %v597_v32 }
 0xb26   :  { %1634 = vmatpush3.bf16.msra.mxu0 %v1903_v6  ;;  %1637 = vmatprep.mubr.msk.bf16.mxu0 %vm1803_vm3, %v1802_v5 }
 0xb27   :  { %1635 = vmatprep.subr.bf16.mxu0 %v1802_v5 }
 0xb2a   :  { %1636 = vmatpush3.bf16.msra.mxu0 %v1910_v7 }
 0xb2b   :  { %1649 = vmatprep.subr.bf16.mxu0 %v1802_v5 }
 0xbe5   :  { %v635_v55 = vpop.f32.mrf.mxu0 }
 0xbe6   :  { %v636_v33 = vadd.f32 %v1947_v36, %v635_v55 }
 0xbe7   :  { %v1623_v34 = vpop.f32.mrf.mxu0 }
 0xbe8   :  { %649 = vrot.lane.b32.xlu1 %v636_v33, %s1804_s30  ;;  %v641_v38 = vadd.f32 %v636_v33, %v1976_v62 }
 0xbe9   :  { %v638_v35 = vpop.f32.mrf.mxu0 }
 0xbea   :  { %v1476_v39 = vmul.f32 -1.442695, %v641_v38 }
 0xbeb   :  { %v1624_v37 = vpop.f32.mrf.mxu0 }
 0xbec   :  { %1760 = vpow2.f32 %v1476_v39 }
 0xbf9   :  { %v1761_v40 = vpop.eup %1760 }
 0xbfa   :  { %v645_v41 = vadd.f32 1.0, %v1761_v40 }
 0xbfc   :  { %1762 = vrcp.f32 %v645_v41 }
 0xc09   :  { %v1763_v42 = vpop.eup %1762 }
 0xc0a   :  { %v659_v49 = vsub.f32 1.0, %v1763_v42  ;;  %v665_v52 = vmul.f32 %v1763_v42, %v593_v30 }
 0xc5a   :  { %v650_v43 = vpop.permute.xlu1 %649 }
 0xc5b   :  { %v652_v44 = vmul.f32 %v1763_v42, %v650_v43 }
 0xc5d   :  { %654 = vrot.lane.b32.xlu0 %v652_v44, %s1804_s30 }
 0xccf   :  { %v655_v45 = vpop.permute.xlu0 %654 }
 0xcd0   :  { %v657_v46 = vadd.f32 %v655_v45, %v1976_v62 }
 0xcd2   :  { %1764 = vtanh.f32 %v657_v46 }
 0xcdf   :  { %v1765_v47 = vpop.eup %1764 }
 0xce0   :  { %661 = vrot.lane.b32.xlu1 %v1765_v47, %s1805_s4 }
 0xd52   :  { %v662_v51 = vpop.permute.xlu1 %661 }
 0xd53   :  { %v664_v53 = vmul.f32 %v662_v51, %v659_v49 }
 0xd55   :  { %v666_v54 = vadd.f32 %v665_v52, %v664_v53 }
 0xd57   :  { %v667_v56 = vpack.c.bf16 %v666_v54, %v666_v54 }
 0xd59   :  { %669 = vrot.lane.b32.xlu0 %v667_v56, %s1805_s4  ;;  %v2082_v56 = vld [vmem:[%s2226_s8] sm:$0xff]  }
 0xdcb   :  { %v670_v57 = vpop.permute.xlu0 %669 }
 0xdcc   :  { %1630 = vmatmul.mubr.msk.bf16.vlgmr.msra.gmra.mxu1 %vm52_vm2, %v670_v57 }
 0xdcd   :  { %1642 = vmatpush3.bf16.msra.mxu1 %v1903_v6  ;;  %1645 = vmatprep.mubr.msk.bf16.mxu1 %vm1803_vm3, %v1802_v5  ;;  %v266_v6 = vadd.f32 %v1962_v48, %v1992_v9 }
 0xdce   :  { %1643 = vmatprep.subr.bf16.mxu1 %v1802_v5 }
 0xdd1   :  { %1644 = vmatpush3.bf16.msra.mxu1 %v1910_v7 }
 0xdd2   :  { %1657 = vmatprep.subr.bf16.mxu1 %v1802_v5 }
 0xe8c   :  { %v708_v62 = vpop.f32.mrf.mxu1 }
 0xe8d   :  { %v709_v58 = vadd.f32 %v1947_v36, %v708_v62 }
 0xe8e   :  { %v1631_v59 = vpop.f32.mrf.mxu1 }
 0xe8f   :  { %722 = vrot.lane.b32.xlu1 %v709_v58, %s1804_s30  ;;  %v714_v1 = vadd.f32 %v709_v58, %v266_v6 }
 0xe90   :  { %v711_v61 = vpop.f32.mrf.mxu1 }
 0xe91   :  { %v1478_v2 = vmul.f32 -1.442695, %v714_v1  ;;  %v2099_v1 = vld [vmem:[%s2227_s9] ss:$0 sm:$0xff] }
 0xe92   :  { %v1632_v63 = vpop.f32.mrf.mxu1 }
 0xe93   :  { %1766 = vpow2.f32 %v1478_v2 }
 0xea0   :  { %v1767_v3 = vpop.eup %1766 }
 0xea1   :  { %v718_v4 = vadd.f32 1.0, %v1767_v3 }
 0xea3   :  { %1768 = vrcp.f32 %v718_v4 }
 0xeb0   :  { %v1769_v7 = vpop.eup %1768 }
 0xeb1   :  { %v732_v13 = vsub.f32 1.0, %v1769_v7  ;;  %v738_v48 = vmul.f32 %v1769_v7, %v666_v54  ;;  %v2076_v54 = vld [vmem:[%s2226_s8 + $0x8] sm:$0xff]  }
 0xf01   :  { %v723_v8 = vpop.permute.xlu1 %722 }
 0xf02   :  { %v725_v10 = vmul.f32 %v1769_v7, %v723_v8 }
 0xf04   :  { %727 = vrot.lane.b32.xlu0 %v725_v10, %s1804_s30  ;;  %v2106_v10 = vld [vmem:[%s2228_s7] ss:$0 sm:$0xff] }
 0xf76   :  { %v728_v11 = vpop.permute.xlu0 %727 }
 0xf77   :  { %v730_v50 = vadd.f32 %v728_v11, %v266_v6 }
 0xf79   :  { %1770 = vtanh.f32 %v730_v50 }
 0xf86   :  { %v1771_v12 = vpop.eup %1770 }
 0xf87   :  { %734 = vrot.lane.b32.xlu1 %v1771_v12, %s1805_s4 }
 0xff9   :  { %v735_v14 = vpop.permute.xlu1 %734 }
 0xffa   :  { %v737_v9 = vmul.f32 %v735_v14, %v732_v13 }
 0xffc   :  { %v739_v15 = vadd.f32 %v738_v48, %v737_v9 }
 0xffe   :  { %v740_v16 = vpack.c.bf16 %v739_v15, %v739_v15 }
0x1000   :  { %742 = vrot.lane.b32.xlu0 %v740_v16, %s1805_s4 }
0x1072   :  { %v743_v17 = vpop.permute.xlu0 %742 }
0x1073   :  { %1638 = vmatmul.mubr.msk.bf16.vlgmr.msra.gmra.mxu0 %vm52_vm2, %v743_v17  ;;  %v2114_v17 = vld [vmem:[%s2229_s10 + $0x8] sm:$0xff]  }
0x1074   :  { %1653 = vmatprep.mubr.msk.bf16.mxu0 %vm1803_vm3, %v1802_v5  ;;  %1650 = vmatpush3.bf16.msra.mxu0 %v2076_v54 }
0x1075   :  { %1651 = vmatprep.subr.bf16.mxu0 %v1802_v5 }
0x1078   :  { %1652 = vmatpush3.bf16.msra.mxu0 %v2082_v56 }
0x1079   :  { %1665 = vmatprep.subr.bf16.mxu0 %v1802_v5 }
0x1133   :  { %v781_v18 = vpop.f32.mrf.mxu0 }
0x1134   :  { %v782_v19 = vadd.f32 %v1947_v36, %v781_v18  ;;  %v2120_v18 = vld [vmem:[%s2229_s10] sm:$0xff]  }
0x1135   :  { %v1639_v20 = vpop.f32.mrf.mxu0 }
0x1136   :  { %795 = vrot.lane.b32.xlu1 %v782_v19, %s1804_s30  ;;  %v787_v23 = vadd.f32 %v782_v19, %v1973_v60 }
0x1137   :  { %v784_v21 = vpop.f32.mrf.mxu0 }
0x1138   :  { %v1480_v24 = vmul.f32 -1.442695, %v787_v23 }
0x1139   :  { %v1640_v22 = vpop.f32.mrf.mxu0 }
0x113a   :  { %1772 = vpow2.f32 %v1480_v24 }
0x1147   :  { %v1773_v25 = vpop.eup %1772 }
0x1148   :  { %v791_v26 = vadd.f32 1.0, %v1773_v25 }
0x114a   :  { %1774 = vrcp.f32 %v791_v26 }
0x1157   :  { %v1775_v27 = vpop.eup %1774 }
0x1158   :  { %v805_v55 = vsub.f32 1.0, %v1775_v27  ;;  %v811_v34 = vmul.f32 %v1775_v27, %v739_v15 }
0x11a8   :  { %v796_v28 = vpop.permute.xlu1 %795 }
0x11a9   :  { %v798_v29 = vmul.f32 %v1775_v27, %v796_v28  ;;  %v2141_v27 = vld [vmem:[%s2230_s11] ss:$0 sm:$0xff] }
0x11ab   :  { %800 = vrot.lane.b32.xlu0 %v798_v29, %s1804_s30 }
0x121d   :  { %v801_v30 = vpop.permute.xlu0 %800 }
0x121e   :  { %v803_v31 = vadd.f32 %v801_v30, %v1973_v60 }
0x1220   :  { %1776 = vtanh.f32 %v803_v31 }
0x122d   :  { %v1777_v32 = vpop.eup %1776 }
0x122e   :  { %807 = vrot.lane.b32.xlu1 %v1777_v32, %s1805_s4 }
0x12a0   :  { %v808_v33 = vpop.permute.xlu1 %807 }
0x12a1   :  { %v810_v35 = vmul.f32 %v808_v33, %v805_v55 }
0x12a3   :  { %v812_v37 = vadd.f32 %v811_v34, %v810_v35 }
0x12a5   :  { %v813_v38 = vpack.c.bf16 %v812_v37, %v812_v37 }
0x12a7   :  { %815 = vrot.lane.b32.xlu0 %v813_v38, %s1805_s4 }
0x1319   :  { %v816_v39 = vpop.permute.xlu0 %815 }
0x131a   :  { %1646 = vmatmul.mubr.msk.bf16.vlgmr.msra.gmra.mxu1 %vm52_vm2, %v816_v39 }
0x131b   :  { %1661 = vmatprep.mubr.msk.bf16.mxu1 %vm1803_vm3, %v1802_v5  ;;  %1658 = vmatpush3.bf16.msra.mxu1 %v2114_v17 }
0x131c   :  { %1659 = vmatprep.subr.bf16.mxu1 %v1802_v5 }
0x131f   :  { %1660 = vmatpush3.bf16.msra.mxu1 %v2120_v18 }
0x1320   :  { %1671 = vmatprep.subr.bf16.mxu1 %v1802_v5 }
0x13da   :  { %v854_v40 = vpop.f32.mrf.mxu1 }
0x13db   :  { %v855_v60 = vadd.f32 %v1947_v36, %v854_v40 }
0x13dc   :  { %v1647_v41 = vpop.f32.mrf.mxu1 }
0x13dd   :  { %868 = vrot.lane.b32.xlu1 %v855_v60, %s1804_s30  ;;  %v860_v44 = vadd.f32 %v855_v60, %v1979_v0 }
0x13de   :  { %v857_v42 = vpop.f32.mrf.mxu1 }
0x13df   :  { %v1482_v45 = vmul.f32 -1.442695, %v860_v44 }
0x13e0   :  { %v1648_v43 = vpop.f32.mrf.mxu1 }
0x13e1   :  { %1778 = vpow2.f32 %v1482_v45 }
0x13ee   :  { %v1779_v46 = vpop.eup %1778 }
0x13ef   :  { %v864_v47 = vadd.f32 1.0, %v1779_v46 }
0x13f1   :  { %1780 = vrcp.f32 %v864_v47 }
0x13fe   :  { %v1781_v49 = vpop.eup %1780 }
0x13ff   :  { %v884_v58 = vmul.f32 %v1781_v49, %v812_v37 }
0x144f   :  { %v869_v51 = vpop.permute.xlu1 %868 }
0x1450   :  { %v871_v52 = vmul.f32 %v1781_v49, %v869_v51  ;;  %v2154_v51 = vld [vmem:[%s2231_s12] sm:$0x1] }
0x1452   :  { %873 = vrot.lane.b32.xlu0 %v871_v52, %s1804_s30 }
0x14c4   :  { %v874_v53 = vpop.permute.xlu0 %873 }
0x14c5   :  { %v876_v36 = vadd.f32 %v874_v53, %v1979_v0  ;;  %v878_v0 = vsub.f32 1.0, %v1781_v49 }
0x14c7   :  { %1782 = vtanh.f32 %v876_v36 }
0x14d4   :  { %v1783_v57 = vpop.eup %1782 }
0x14d5   :  { %880 = vrot.lane.b32.xlu1 %v1783_v57, %s1805_s4 }
0x1547   :  { %v881_v62 = vpop.permute.xlu1 %880 }
0x1548   :  { %v883_v59 = vmul.f32 %v881_v62, %v878_v0 }
0x154a   :  { %v2088_v61 = vadd.f32 %v884_v58, %v883_v59 }
0x154c   :  { %v919_v63 = vpack.c.bf16 %v2088_v61, %v2088_v61 }
0x154e   :  { %921 = vrot.lane.b32.xlu0 %v919_v63, %s1805_s4 }
0x15c0   :  { %v922_v6 = vpop.permute.xlu0 %921 }
0x15c1   :  { %1654 = vmatmul.mubr.msk.bf16.vlgmr.msra.gmra.mxu0 %vm52_vm2, %v922_v6 }
0x15c2   :  { %1667 = vmatprep.mubr.msk.bf16.mxu0 %vm1803_vm3, %v1802_v5 }
0x1681   :  { %v972_v2 = vpop.f32.mrf.mxu0 }
0x1682   :  { %v973_v3 = vadd.f32 %v2099_v1, %v972_v2 }
0x1683   :  { %v1655_v4 = vpop.f32.mrf.mxu0 }
0x1684   :  { %992 = vrot.lane.b32.xlu1 %v973_v3, %s1804_s30  ;;  %v984_v11 = vadd.f32 %v2106_v10, %v973_v3 }
0x1685   :  { %v975_v7 = vpop.f32.mrf.mxu0 }
0x1686   :  { %v1489_v50 = vmul.f32 -1.442695, %v984_v11 }
0x1687   :  { %v1656_v8 = vpop.f32.mrf.mxu0 }
0x1688   :  { %1784 = vpow2.f32 %v1489_v50 }
0x1695   :  { %v1785_v12 = vpop.eup %1784 }
0x1696   :  { %v988_v13 = vadd.f32 1.0, %v1785_v12 }
0x1698   :  { %1786 = vrcp.f32 %v988_v13 }
0x16a5   :  { %v1787_v14 = vpop.eup %1786 }
0x16a6   :  { %v1002_v20 = vsub.f32 1.0, %v1787_v14  ;;  %v1008_v22 = vmul.f32 %v1787_v14, %v2088_v61 }
0x16f6   :  { %v993_v48 = vpop.permute.xlu1 %992 }
0x16f7   :  { %v995_v9 = vmul.f32 %v1787_v14, %v993_v48 }
0x16f9   :  { %997 = vrot.lane.b32.xlu0 %v995_v9, %s1804_s30 }
0x176b   :  { %v998_v15 = vpop.permute.xlu0 %997 }
0x176c   :  { %v1000_v16 = vadd.f32 %v2106_v10, %v998_v15 }
0x176e   :  { %1788 = vtanh.f32 %v1000_v16 }
0x177b   :  { %v1789_v19 = vpop.eup %1788 }
0x177c   :  { %1004 = vrot.lane.b32.xlu1 %v1789_v19, %s1805_s4 }
0x17ee   :  { %v1005_v21 = vpop.permute.xlu1 %1004 }
0x17ef   :  { %v1007_v23 = vmul.f32 %v1005_v21, %v1002_v20 }
0x17f1   :  { %v1009_v24 = vadd.f32 %v1008_v22, %v1007_v23 }
0x17f3   :  { %v1010_v25 = vpack.c.bf16 %v1009_v24, %v1009_v24 }
0x17f5   :  { %1012 = vrot.lane.b32.xlu0 %v1010_v25, %s1805_s4  ;;  %v918_v25 = vld [vmem:[%s2232_s13] sm:$0x3] }
0x1867   :  { %v1013_v26 = vpop.permute.xlu0 %1012 }
0x1868   :  { %1662 = vmatmul.mubr.msk.bf16.vlgmr.msra.gmra.mxu1 %vm52_vm2, %v1013_v26 }
0x1869   :  { %1672 = vmatpush3.bf16.msra.mxu1 %v2076_v54  ;;  %1675 = vmatprep.mubr.msk.bf16.mxu1 %vm1803_vm3, %v1802_v5 }
0x186a   :  { %1673 = vmatprep.subr.bf16.mxu1 %v1802_v5 }
0x186d   :  { %1674 = vmatpush3.bf16.msra.mxu1 %v2082_v56 }
0x186e   :  { %1687 = vmatprep.subr.bf16.mxu1 %v1802_v5 }
0x1870   :  { %1676 = vmatmul.mubr.msk.bf16.vlgmr.msra.gmra.mxu1 %vm52_vm2, %v1013_v26 }
0x1871   :  { %1689 = vmatprep.mubr.msk.bf16.mxu1 %vm1803_vm3, %v1802_v5 }
0x1928   :  { %v1063_v28 = vpop.f32.mrf.mxu1 }
0x1929   :  { %v1064_v29 = vadd.f32 %v2141_v27, %v1063_v28 }
0x192a   :  { %v1663_v30 = vpop.f32.mrf.mxu1 }
0x192b   :  { %v1069_v31 = vmax.f32 %v1064_v29, 0.0 }
0x192c   :  { %v1066_v32 = vpop.f32.mrf.mxu1 }
0x192d   :  { %v1070_v55 = vpack.c.bf16 %v1069_v31, %v1069_v31 }
0x192e   :  { %v1664_v33 = vpop.f32.mrf.mxu1 }
0x192f   :  { %v1080_v34 = vsel %vm52_vm2, %v1070_v55, 0 }
0x1930   :  { %1666 = vmatpush3.bf16.xpose.msra.mxu0 %v1080_v34  ;;  %v1158_v35 = vpop.f32.mrf.mxu1 }
0x1931   :  { %v1159_v37 = vadd.f32 %v2099_v1, %v1158_v35  ;;  %1679 = vmatprep.subr.bf16.mxu0 %v1802_v5 }
0x1932   :  { %v1677_v38 = vpop.f32.mrf.mxu1 }
0x1933   :  { %1172 = vrot.lane.b32.xlu1 %v1159_v37, %s1804_s30  ;;  %v1164_v60 = vadd.f32 %v2106_v10, %v1159_v37 }
0x1934   :  { %v1161_v39 = vpop.f32.mrf.mxu1 }
0x1935   :  { %v1495_v41 = vmul.f32 -1.442695, %v1164_v60 }
0x1936   :  { %v1678_v40 = vpop.f32.mrf.mxu1 }
0x1937   :  { %1790 = vpow2.f32 %v1495_v41  ;;  %1668 = vmatmul.mubr.msk.bf16.vlgmr.msra.gmra.mxu0 %vm52_vm2, %v2154_v51 }
0x1938   :  { %1680 = vmatpush3.bf16.msra.mxu0 %v2114_v17  ;;  %1683 = vmatprep.mubr.msk.bf16.mxu0 %vm1803_vm3, %v1802_v5 }
0x1939   :  { %1681 = vmatprep.subr.bf16.mxu0 %v1802_v5 }
0x193c   :  { %1682 = vmatpush3.bf16.msra.mxu0 %v2120_v18 }
0x193d   :  { %1693 = vmatprep.subr.bf16.mxu0 %v1802_v5 }
0x1944   :  { %v1791_v42 = vpop.eup %1790 }
0x1945   :  { %v1168_v43 = vadd.f32 1.0, %v1791_v42 }
0x1947   :  { %1792 = vrcp.f32 %v1168_v43 }
0x1954   :  { %v1793_v44 = vpop.eup %1792 }
0x1955   :  { %v1182_v53 = vsub.f32 1.0, %v1793_v44  ;;  %v1188_v57 = vmul.f32 %v1793_v44, %v1009_v24 }
0x19a5   :  { %v1173_v45 = vpop.permute.xlu1 %1172 }
0x19a6   :  { %v1175_v46 = vmul.f32 %v1793_v44, %v1173_v45 }
0x19a8   :  { %1177 = vrot.lane.b32.xlu0 %v1175_v46, %s1804_s30 }
0x19f7   :  { %v2166_v59 = vpop.f32.mrf.mxu0 }
0x19f9   :  { %v1669_v63 = vpop.f32.mrf.mxu0 }
0x19fb   :  { %v1119_v6 = vpop.f32.mrf.mxu0 }
0x19fd   :  { %v1670_v2 = vpop.f32.mrf.mxu0 }
0x1a1a   :  { %v1178_v47 = vpop.permute.xlu0 %1177 }
0x1a1b   :  { %v1180_v49 = vadd.f32 %v2106_v10, %v1178_v47 }
0x1a1d   :  { %1794 = vtanh.f32 %v1180_v49 }
0x1a2a   :  { %v1795_v52 = vpop.eup %1794 }
0x1a2b   :  { %1184 = vrot.lane.b32.xlu1 %v1795_v52, %s1805_s4 }
0x1a9d   :  { %v1185_v36 = vpop.permute.xlu1 %1184 }
0x1a9e   :  { %v1187_v0 = vmul.f32 %v1185_v36, %v1182_v53 }
0x1aa0   :  { %v1189_v62 = vadd.f32 %v1188_v57, %v1187_v0 }
0x1aa2   :  { %v1190_v58 = vpack.c.bf16 %v1189_v62, %v1189_v62 }
0x1aa4   :  { %1192 = vrot.lane.b32.xlu0 %v1190_v58, %s1805_s4 }
0x1b16   :  { %v1193_v3 = vpop.permute.xlu0 %1192 }
0x1b17   :  { %1684 = vmatmul.mubr.msk.bf16.vlgmr.msra.gmra.mxu0 %vm52_vm2, %v1193_v3 }
0x1b18   :  { %1694 = vmatpush3.bf16.msra.mxu0 %v2076_v54  ;;  %1697 = vmatprep.mubr.msk.bf16.mxu0 %vm1803_vm3, %v1802_v5 }
0x1b19   :  { %1695 = vmatprep.subr.bf16.mxu0 %v1802_v5 }
0x1b1c   :  { %1696 = vmatpush3.bf16.msra.mxu0 %v2082_v56 }
0x1b1d   :  { %1709 = vmatprep.subr.bf16.mxu0 %v1802_v5 }
0x1b1f   :  { %1698 = vmatmul.mubr.msk.bf16.vlgmr.msra.gmra.mxu0 %vm52_vm2, %v1193_v3 }
0x1b20   :  { %1711 = vmatprep.mubr.msk.bf16.mxu0 %vm1803_vm3, %v1802_v5 }
0x1bd7   :  { %v1231_v4 = vpop.f32.mrf.mxu0 }
0x1bd8   :  { %v1232_v7 = vadd.f32 %v2141_v27, %v1231_v4 }
0x1bd9   :  { %v1685_v8 = vpop.f32.mrf.mxu0 }
0x1bda   :  { %v1237_v11 = vmax.f32 %v1232_v7, 0.0 }
0x1bdb   :  { %v1234_v54 = vpop.f32.mrf.mxu0 }
0x1bdc   :  { %v1238_v50 = vpack.c.bf16 %v1237_v11, %v1237_v11 }
0x1bdd   :  { %v1686_v12 = vpop.f32.mrf.mxu0 }
0x1bde   :  { %v1240_v13 = vsel %vm52_vm2, %v1238_v50, 0 }
0x1bdf   :  { %1688 = vmatpush3.bf16.xpose.msra.mxu1 %v1240_v13  ;;  %v1318_v14 = vpop.f32.mrf.mxu0 }
0x1be0   :  { %v1319_v56 = vadd.f32 %v2099_v1, %v1318_v14  ;;  %1701 = vmatprep.subr.bf16.mxu1 %v1802_v5 }
0x1be1   :  { %v1699_v48 = vpop.f32.mrf.mxu0 }
0x1be2   :  { %1332 = vrot.lane.b32.xlu1 %v1319_v56, %s1804_s30  ;;  %v1324_v1 = vadd.f32 %v2106_v10, %v1319_v56 }
0x1be3   :  { %v1321_v9 = vpop.f32.mrf.mxu0 }
0x1be4   :  { %v1500_v16 = vmul.f32 -1.442695, %v1324_v1 }
0x1be5   :  { %v1700_v15 = vpop.f32.mrf.mxu0 }
0x1be6   :  { %1690 = vmatmul.mubr.msk.bf16.vlgmr.msra.gmra.mxu1 %vm52_vm2, %v2154_v51  ;;  %1796 = vpow2.f32 %v1500_v16 }
0x1be7   :  { %1702 = vmatpush3.bf16.msra.mxu1 %v2114_v17  ;;  %1705 = vmatprep.mubr.msk.bf16.mxu1 %vm1803_vm3, %v1802_v5  ;;  %v1807_v17 = vmov 0  }
0x1be8   :  { %1703 = vmatprep.subr.bf16.mxu1 %v1802_v5  ;;  %1722 = vset.pattern.permute.xlu1 %v1807_v17 }
0x1be9   :  { %1723 = vset.pattern.permute.xlu0 %v1807_v17 }
0x1beb   :  { %1704 = vmatpush3.bf16.msra.mxu1 %v2120_v18 }
0x1bf3   :  { %v1797_v19 = vpop.eup %1796 }
0x1bf4   :  { %v1328_v20 = vadd.f32 1.0, %v1797_v19 }
0x1bf6   :  { %1798 = vrcp.f32 %v1328_v20 }
0x1c03   :  { %v1799_v21 = vpop.eup %1798 }
0x1c04   :  { %v1342_v28 = vsub.f32 1.0, %v1799_v21  ;;  %v1348_v31 = vmul.f32 %v1799_v21, %v1189_v62 }
0x1c54   :  { %v1333_v22 = vpop.permute.xlu1 %1332 }
0x1c55   :  { %v1335_v23 = vmul.f32 %v1799_v21, %v1333_v22 }
0x1c57   :  { %1337 = vrot.lane.b32.xlu0 %v1335_v23, %s1804_s30 }
0x1ca6   :  { %v1276_v26 = vpop.f32.mrf.mxu1 }
0x1ca8   :  { %v1691_v30 = vpop.f32.mrf.mxu1 }
0x1caa   :  { %v1279_v55 = vpop.f32.mrf.mxu1 }
0x1cac   :  { %v1692_v34 = vpop.f32.mrf.mxu1 }
0x1cc9   :  { %v1338_v24 = vpop.permute.xlu0 %1337 }
0x1cca   :  { %v1340_v5 = vadd.f32 %v2106_v10, %v1338_v24 }
0x1ccc   :  { %1800 = vtanh.f32 %v1340_v5 }
0x1cd9   :  { %v1801_v18 = vpop.eup %1800 }
0x1cda   :  { %1344 = vrot.lane.b32.xlu1 %v1801_v18, %s1805_s4 }
0x1cde   :  { %1073 = vperm.xlu1 %1722, %v918_v25  }
0x1d4c   :  { %v1345_v29 = vpop.permute.xlu1 %1344 }
0x1d4d   :  { %v1347_v32 = vmul.f32 %v1345_v29, %v1342_v28 }
0x1d4f   :  { %v1349_v33 = vadd.f32 %v1348_v31, %v1347_v32 }
0x1d51   :  { %v1350_v35 = vpack.c.bf16 %v1349_v33, %v1349_v33 }
0x1d53   :  { %1352 = vrot.lane.b32.xlu0 %v1350_v35, %s1805_s4 }
0x1d57   :  { %887 = vrot.lane.b32.xlu0 %v2088_v61, %s1805_s4 }
0x1d59   :  { %v1074_v10 = vpop.permute.xlu1 %1073 }
0x1d5a   :  { %v1117_v37 = vadd.f32 %v2166_v59, %v1074_v10  ;;  %v1277_v38 = vadd.f32 %v1276_v26, %v1074_v10 }
0x1d5c   :  { %1123 = vst.msk [vmem:[%s2233_s14] sm:$0x3] %vm1122_vm4, %v1117_v37  ;;  %1498 = vst.msk [vmem:[%s2233_s14 + $0x2] sm:$0x3] %vm1122_vm4, %v1277_v38 }
0x1dc5   :  { %v1353_v39 = vpop.permute.xlu0 %1352 }
0x1dc6   :  { %1706 = vmatmul.mubr.msk.bf16.vlgmr.msra.gmra.mxu1 %vm52_vm2, %v1353_v39 }
0x1dc9   :  { %v888_v40 = vpop.permute.xlu0 %887 }
0x1dca   :  { %890 = vst.msk [vmem:[#allocation2] sm:$0xff] %vm52_vm2, %v888_v40 }
0x1e86   :  { %v1391_v61 = vpop.f32.mrf.mxu1 }
0x1e87   :  { %v1392_v60 = vadd.f32 %v2141_v27, %v1391_v61 }
0x1e88   :  { %v1707_v41 = vpop.f32.mrf.mxu1 }
0x1e89   :  { %v1397_v42 = vmax.f32 %v1392_v60, 0.0 }
0x1e8a   :  { %v1394_v43 = vpop.f32.mrf.mxu1 }
0x1e8b   :  { %v1398_v44 = vpack.c.bf16 %v1397_v42, %v1397_v42 }
0x1e8c   :  { %v1708_v45 = vpop.f32.mrf.mxu1 }
0x1e8d   :  { %v1400_v46 = vsel %vm52_vm2, %v1398_v44, 0 }
0x1e8e   :  { %1710 = vmatpush3.bf16.xpose.msra.mxu0 %v1400_v46 }
0x1e95   :  { %1712 = vmatmul.mubr.msk.bf16.vlgmr.msra.gmra.mxu0 %vm52_vm2, %v2154_v51 }
0x1f55   :  { %v1436_v47 = vpop.f32.mrf.mxu0 }
0x1f56   :  { %v1437_v49 = vadd.f32 %v1436_v47, %v1074_v10 }
0x1f57   :  { %v1713_v52 = vpop.f32.mrf.mxu0 }
0x1f58   :  { %1503 = vst.msk [vmem:[%s2233_s14 + $0x4] sm:$0x3] %vm1122_vm4, %v1437_v49 }
0x1f59   :  { %v1439_v27 = vpop.f32.mrf.mxu0 }
0x1f5b   :  { %v1714_v53 = vpop.f32.mrf.mxu0 }

</bundles_post_ra>
